<compile_context>
chip_gen: v7x
topology: tpu7x:2x2x1
jax: 0.10.0
libtpu: 0.0.40
codegen_flags: <defaults>
</compile_context>

<pallas_src>
import jax
import jax.numpy as jnp
from jax.experimental import pallas as pl
from jax.experimental.pallas import tpu as pltpu


def _dual_rot_head_kernel(x_ref, w1_ref, b1_ref, w2_ref, b2_ref, w3_ref,
                          b3_ref, w4_ref, b4_ref, out_ref):
    """Fused Rot_green + Rot_red heads, single invocation, batch folded into lanes.

    x_ref  : (C, B*N)      f32  per-point features; channels on sublanes, batch*points on lanes
    w1_ref : (2*H1, C)     f32  layer-1 weights of both heads stacked along M
    b1_ref : (2*H1, 1)     f32
    w2_ref : (2*H2, 2*H1)  f32  block-diag(w2_green, w2_red)
    b2_ref : (2*H2, 1)     f32
    w3_ref : (2*H3, 2*H2)  f32  block-diag
    b3_ref : (2*H3, 1)     f32
    w4_ref : (8, 2*H3)     f32  block-diag -> rows 0..3 green head, rows 4..7 red head
    b4_ref : (8, 1)        f32
    out_ref: (2, 4, B)     f32  out[h, 0, b] = f_R, out[h, 1:4, b] = p_R
    """
    B = out_ref.shape[2]
    N = x_ref.shape[1] // B

    x = x_ref[...]                                                     # (C, B*N)
    z = jnp.dot(w1_ref[...], x, preferred_element_type=jnp.float32) + b1_ref[...]
    z = jnp.maximum(z, 0.0)                                            # (2*H1, B*N)
    z = jnp.dot(w2_ref[...], z, preferred_element_type=jnp.float32) + b2_ref[...]
    z = jnp.maximum(z, 0.0)                                            # (2*H2, B*N)
    z = jnp.dot(w3_ref[...], z, preferred_element_type=jnp.float32) + b3_ref[...]
    z = jnp.maximum(z, 0.0)                                            # (2*H3, B*N); dropout = identity
    y = jnp.dot(w4_ref[...], z, preferred_element_type=jnp.float32) + b4_ref[...]  # (8, B*N)

    # Global max over points, per batch: static 128-aligned lane slices.
    cols = [jnp.max(y[:, b * N:(b + 1) * N], axis=1, keepdims=True) for b in range(B)]
    m = jnp.concatenate(cols, axis=1) if B > 1 else cols[0]            # (8, B)

    # Epilogue: p = r[1:4] / (||r[1:4]|| + 1e-6), f = sigmoid(r[0]) -- mask form, one
    # pass per head over all batches at once.
    ch = jax.lax.broadcasted_iota(jnp.int32, (4, B), 0)                # channel index 0..3
    for h in range(2):                                                 # 0 = green, 1 = red
        r = m[4 * h:4 * h + 4, :]                                      # (4, B)
        sq = jnp.where(ch >= 1, r * r, 0.0)
        nrm = jnp.sqrt(jnp.sum(sq, axis=0, keepdims=True))             # (1, B)
        out_ref[h] = jnp.where(ch == 0, jax.nn.sigmoid(r), r / (nrm + 1e-6))


def _fold_bn(w, b, gamma, beta, mean, var, eps=1e-5):
    """Fold eval-mode BatchNorm1d into a pointwise conv (w: (Cin,Cout), b: (Cout,))."""
    s = gamma / jnp.sqrt(var + eps)
    return w * s[None, :], b * s + (beta - mean * s)


def _fold_head(params):
    """BN-fold one head; returns [(w (Cout,Cin), b (Cout,1)), ...] per layer, f32."""
    w1, b1 = _fold_bn(params["w1"], params["b1"], *params["bn1"])
    w2, b2 = _fold_bn(params["w2"], params["b2"], *params["bn2"])
    w3, b3 = _fold_bn(params["w3"], params["b3"], *params["bn3"])
    w4, b4 = params["w4"], params["b4"]
    return [(w.T.astype(jnp.float32), b.reshape(-1, 1).astype(jnp.float32))
            for w, b in ((w1, b1), (w2, b2), (w3, b3), (w4, b4))]


def _block_diag(a, b):
    m1, n1 = a.shape
    m2, n2 = b.shape
    top = jnp.concatenate([a, jnp.zeros((m1, n2), a.dtype)], axis=1)
    bot = jnp.concatenate([jnp.zeros((m2, n1), b.dtype), b], axis=1)
    return jnp.concatenate([top, bot], axis=0)


def pack_dual_rot_head_params(params_green, params_red):
    """One-time (model-load) BN fold + dual-head packing. Keep OUT of the per-call path."""
    g, r = _fold_head(params_green), _fold_head(params_red)
    w1 = jnp.concatenate([g[0][0], r[0][0]], axis=0)                   # (2*H1, C)
    b1 = jnp.concatenate([g[0][1], r[0][1]], axis=0)                   # (2*H1, 1)
    w2 = _block_diag(g[1][0], r[1][0])
    b2 = jnp.concatenate([g[1][1], r[1][1]], axis=0)
    w3 = _block_diag(g[2][0], r[2][0])
    b3 = jnp.concatenate([g[2][1], r[2][1]], axis=0)
    w4 = _block_diag(g[3][0], r[3][0])                                 # (8, 2*H3)
    b4 = jnp.concatenate([g[3][1], r[3][1]], axis=0)                   # (8, 1)
    return (w1, b1, w2, b2, w3, b3, w4, b4)


@jax.jit
def posenet_rot_heads_forward(feat, packed):
    """feat: (B, C, N) f32 -- exactly what PoseNet9D hands to rot_green/rot_red
    (channels-first).  `packed` = pack_dual_rot_head_params(...) computed once.
    Returns (p_green_R (B,3), f_green_R (B,), p_red_R (B,3), f_red_R (B,))."""
    B, C, N = feat.shape
    # Tiny relayout so every layer runs once with B*N lanes (fills the 256-wide MXU).
    x = jnp.transpose(feat, (1, 0, 2)).reshape(C, B * N).astype(jnp.float32)

    vmem = pl.BlockSpec(memory_space=pltpu.MemorySpace.VMEM)           # whole array in VMEM
    out = pl.pallas_call(
        _dual_rot_head_kernel,
        out_shape=jax.ShapeDtypeStruct((2, 4, B), jnp.float32),
        in_specs=[vmem] * 9,
        out_specs=vmem,
    )(x, *packed)

    p_green, f_green = out[0, 1:4, :].T, out[0, 0, :]
    p_red, f_red = out[1, 1:4, :].T, out[1, 0, :]
    return p_green, f_green, p_red, f_red


def init_params(key, dims):
    """dims = (input_c, h1, h2, h3, 4); deterministic synthetic parameters for one head."""
    c, h1, h2, h3, k = dims
    keys = jax.random.split(key, 14)
    norm = lambda kk, shape, s=0.05: s * jax.random.normal(kk, shape, jnp.float32)

    def bn(k1, k2, n):
        gamma = 1.0 + 0.1 * jax.random.normal(k1, (n,), jnp.float32)
        beta = 0.05 * jax.random.normal(k2, (n,), jnp.float32)
        return gamma, beta, jnp.zeros((n,), jnp.float32), jnp.ones((n,), jnp.float32)

    return {
        "w1": norm(keys[0], (c, h1)), "b1": norm(keys[1], (h1,)),
        "w2": norm(keys[2], (h1, h2)), "b2": norm(keys[3], (h2,)),
        "w3": norm(keys[4], (h2, h3)), "b3": norm(keys[5], (h3,)),
        "w4": norm(keys[6], (h3, k)), "b4": norm(keys[7], (k,)),
        "bn1": bn(keys[8], keys[9], h1),
        "bn2": bn(keys[10], keys[11], h2),
        "bn3": bn(keys[12], keys[13], h3),
    }


def rot_head_reference(feat, params):
    """Pure-JAX eval-mode reference of one rotation head (f32 throughout)."""
    x = jnp.transpose(feat, (0, 2, 1))                                 # (B, N, C)
    w1, b1 = _fold_bn(params["w1"], params["b1"], *params["bn1"])
    w2, b2 = _fold_bn(params["w2"], params["b2"], *params["bn2"])
    w3, b3 = _fold_bn(params["w3"], params["b3"], *params["bn3"])
    h = jax.nn.relu(x @ w1 + b1)
    h = jax.nn.relu(h @ w2 + b2)
    h = jax.nn.relu(h @ w3 + b3)
    y = h @ params["w4"] + params["b4"]                                # (B, N, 4)
    r = jnp.max(y, axis=1)                                             # (B, 4)
    p = r[:, 1:] / (jnp.linalg.norm(r[:, 1:], axis=1, keepdims=True) + 1e-6)
    f = jax.nn.sigmoid(r[:, 0])
    return p, f


if __name__ == "__main__":
    B, C, N = 2, 64, 128                      # batch=2, feature channels=64, 128 points
    dims = (C, 128, 64, 64, 4)                # scaled-down Rot_green / Rot_red channel stack

    kg, kr, kx = jax.random.split(jax.random.PRNGKey(0), 3)
    params_green = init_params(kg, dims)
    params_red = init_params(kr, dims)
    # `feat` as the rotation heads receive it inside PoseNet9D: (B, C, N) channels-first.
    feat = jax.random.normal(kx, (B, C, N), jnp.float32)

    # One-time weight packing (BN fold, head fusion) -- outside the per-call path.
    packed = pack_dual_rot_head_params(params_green, params_red)
    packed = jax.block_until_ready(packed)

    p_g, f_g, p_r, f_r = posenet_rot_heads_forward(feat, packed)
    jax.block_until_ready((p_g, f_g, p_r, f_r))

    p_g_ref, f_g_ref = rot_head_reference(feat, params_green)
    p_r_ref, f_r_ref = rot_head_reference(feat, params_red)

    assert p_g.shape == (B, 3) and f_g.shape == (B,)
    assert p_r.shape == (B, 3) and f_r.shape == (B,)
    for got, want in ((p_g, p_g_ref), (f_g, f_g_ref), (p_r, p_r_ref), (f_r, f_r_ref)):
        assert jnp.allclose(got, want, atol=5e-3, rtol=5e-3)

    print("KERNEL_OK")
</pallas_src>

<mosaic_0001>
module attributes {stable_mosaic.version = 11 : i64} {
  func.func @_dual_rot_head_kernel(%arg0: memref<64x256xf32, #tpu.memory_space<vmem>>, %arg1: memref<256x64xf32, #tpu.memory_space<vmem>>, %arg2: memref<256x1xf32, #tpu.memory_space<vmem>>, %arg3: memref<128x256xf32, #tpu.memory_space<vmem>>, %arg4: memref<128x1xf32, #tpu.memory_space<vmem>>, %arg5: memref<128x128xf32, #tpu.memory_space<vmem>>, %arg6: memref<128x1xf32, #tpu.memory_space<vmem>>, %arg7: memref<8x128xf32, #tpu.memory_space<vmem>>, %arg8: memref<8x1xf32, #tpu.memory_space<vmem>>, %arg9: memref<2x4x2xf32, #tpu.memory_space<vmem>>) attributes {dimension_semantics = [], scalar_prefetch = 0 : i64, scratch_operands = 0 : i64, tpu.core_type = #tpu.core_type<tc>} {
    %c0 = arith.constant 0 : index
    %c0_0 = arith.constant 0 : index
    %0 = vector.load %arg0[%c0, %c0_0] : memref<64x256xf32, #tpu.memory_space<vmem>>, vector<64x256xf32>
    %c0_1 = arith.constant 0 : index
    %c0_2 = arith.constant 0 : index
    %1 = vector.load %arg1[%c0_1, %c0_2] : memref<256x64xf32, #tpu.memory_space<vmem>>, vector<256x64xf32>
    %cst = arith.constant dense<0.000000e+00> : vector<256x256xf32>
    %2 = tpu.matmul %1, %0, %cst {dimension_numbers = #tpu.dot_dimension_numbers<[1], [0], [0], [1], [0, 0, 1, 1], [], []>} : vector<256x64xf32>, vector<64x256xf32>, vector<256x256xf32> -> vector<256x256xf32>
    %c0_3 = arith.constant 0 : index
    %c0_4 = arith.constant 0 : index
    %3 = vector.load %arg2[%c0_3, %c0_4] : memref<256x1xf32, #tpu.memory_space<vmem>>, vector<256x1xf32>
    %4 = vector.broadcast %3 : vector<256x1xf32> to vector<256x256xf32>
    %5 = arith.addf %2, %4 : vector<256x256xf32>
    %cst_5 = arith.constant 0.000000e+00 : f32
    %6 = vector.broadcast %cst_5 : f32 to vector<256x256xf32>
    %7 = arith.maximumf %5, %6 : vector<256x256xf32>
    %c0_6 = arith.constant 0 : index
    %c0_7 = arith.constant 0 : index
    %8 = vector.load %arg3[%c0_6, %c0_7] : memref<128x256xf32, #tpu.memory_space<vmem>>, vector<128x256xf32>
    %cst_8 = arith.constant dense<0.000000e+00> : vector<128x256xf32>
    %9 = tpu.matmul %8, %7, %cst_8 {dimension_numbers = #tpu.dot_dimension_numbers<[1], [0], [0], [1], [0, 0, 1, 1], [], []>} : vector<128x256xf32>, vector<256x256xf32>, vector<128x256xf32> -> vector<128x256xf32>
    %c0_9 = arith.constant 0 : index
    %c0_10 = arith.constant 0 : index
    %10 = vector.load %arg4[%c0_9, %c0_10] : memref<128x1xf32, #tpu.memory_space<vmem>>, vector<128x1xf32>
    %11 = vector.broadcast %10 : vector<128x1xf32> to vector<128x256xf32>
    %12 = arith.addf %9, %11 : vector<128x256xf32>
    %cst_11 = arith.constant 0.000000e+00 : f32
    %13 = vector.broadcast %cst_11 : f32 to vector<128x256xf32>
    %14 = arith.maximumf %12, %13 : vector<128x256xf32>
    %c0_12 = arith.constant 0 : index
    %c0_13 = arith.constant 0 : index
    %15 = vector.load %arg5[%c0_12, %c0_13] : memref<128x128xf32, #tpu.memory_space<vmem>>, vector<128x128xf32>
    %cst_14 = arith.constant dense<0.000000e+00> : vector<128x256xf32>
    %16 = tpu.matmul %15, %14, %cst_14 {dimension_numbers = #tpu.dot_dimension_numbers<[1], [0], [0], [1], [0, 0, 1, 1], [], []>} : vector<128x128xf32>, vector<128x256xf32>, vector<128x256xf32> -> vector<128x256xf32>
    %c0_15 = arith.constant 0 : index
    %c0_16 = arith.constant 0 : index
    %17 = vector.load %arg6[%c0_15, %c0_16] : memref<128x1xf32, #tpu.memory_space<vmem>>, vector<128x1xf32>
    %18 = vector.broadcast %17 : vector<128x1xf32> to vector<128x256xf32>
    %19 = arith.addf %16, %18 : vector<128x256xf32>
    %cst_17 = arith.constant 0.000000e+00 : f32
    %20 = vector.broadcast %cst_17 : f32 to vector<128x256xf32>
    %21 = arith.maximumf %19, %20 : vector<128x256xf32>
    %c0_18 = arith.constant 0 : index
    %c0_19 = arith.constant 0 : index
    %22 = vector.load %arg7[%c0_18, %c0_19] : memref<8x128xf32, #tpu.memory_space<vmem>>, vector<8x128xf32>
    %cst_20 = arith.constant dense<0.000000e+00> : vector<8x256xf32>
    %23 = tpu.matmul %22, %21, %cst_20 {dimension_numbers = #tpu.dot_dimension_numbers<[1], [0], [0], [1], [0, 0, 1, 1], [], []>} : vector<8x128xf32>, vector<128x256xf32>, vector<8x256xf32> -> vector<8x256xf32>
    %c0_21 = arith.constant 0 : index
    %c0_22 = arith.constant 0 : index
    %24 = vector.load %arg8[%c0_21, %c0_22] : memref<8x1xf32, #tpu.memory_space<vmem>>, vector<8x1xf32>
    %25 = vector.broadcast %24 : vector<8x1xf32> to vector<8x256xf32>
    %26 = arith.addf %23, %25 : vector<8x256xf32>
    %27 = vector.extract_strided_slice %26 {offsets = [0, 0], sizes = [8, 128], strides = [1, 1]} : vector<8x256xf32> to vector<8x128xf32>
    %cst_23 = arith.constant dense<0xFF800000> : vector<8xf32>
    %28 = vector.multi_reduction <maximumf>, %27, %cst_23 [1] : vector<8x128xf32> to vector<8xf32>
    %29 = vector.shape_cast %28 : vector<8xf32> to vector<8x1xf32>
    %30 = vector.extract_strided_slice %26 {offsets = [0, 128], sizes = [8, 128], strides = [1, 1]} : vector<8x256xf32> to vector<8x128xf32>
    %cst_24 = arith.constant dense<0xFF800000> : vector<8xf32>
    %31 = vector.multi_reduction <maximumf>, %30, %cst_24 [1] : vector<8x128xf32> to vector<8xf32>
    %32 = vector.shape_cast %31 : vector<8xf32> to vector<8x1xf32>
    %33 = tpu.concatenate %29, %32 in 1 : vector<8x1xf32>, vector<8x1xf32> -> vector<8x2xf32>
    %34 = tpu.iota {dimensions = array<i32: 0>} : vector<4x2xi32>
    %35 = vector.extract_strided_slice %33 {offsets = [0, 0], sizes = [4, 2], strides = [1, 1]} : vector<8x2xf32> to vector<4x2xf32>
    %c1_i32 = arith.constant 1 : i32
    %36 = vector.broadcast %c1_i32 : i32 to vector<4x2xi32>
    %37 = arith.cmpi sge, %34, %36 : vector<4x2xi32>
    %38 = arith.mulf %35, %35 : vector<4x2xf32>
    %cst_25 = arith.constant 0.000000e+00 : f32
    %39 = vector.broadcast %cst_25 : f32 to vector<4x2xf32>
    %40 = arith.select %37, %38, %39 : vector<4x2xi1>, vector<4x2xf32>
    %cst_26 = arith.constant dense<0.000000e+00> : vector<2xf32>
    %41 = vector.multi_reduction <add>, %40, %cst_26 [0] : vector<4x2xf32> to vector<2xf32>
    %42 = vector.shape_cast %41 : vector<2xf32> to vector<1x2xf32>
    %43 = math.sqrt %42 : vector<1x2xf32>
    %c0_i32 = arith.constant 0 : i32
    %44 = vector.broadcast %c0_i32 : i32 to vector<4x2xi32>
    %45 = arith.cmpi eq, %34, %44 : vector<4x2xi32>
    %46 = arith.negf %35 : vector<4x2xf32>
    %47 = math.exp %46 : vector<4x2xf32>
    %cst_27 = arith.constant 1.000000e+00 : f32
    %48 = vector.broadcast %cst_27 : f32 to vector<4x2xf32>
    %49 = arith.addf %48, %47 : vector<4x2xf32>
    %50 = arith.divf %48, %49 : vector<4x2xf32>
    %cst_28 = arith.constant 9.99999997E-7 : f32
    %51 = vector.broadcast %cst_28 : f32 to vector<1x2xf32>
    %52 = arith.addf %43, %51 : vector<1x2xf32>
    %53 = vector.broadcast %52 : vector<1x2xf32> to vector<4x2xf32>
    %54 = arith.divf %35, %53 : vector<4x2xf32>
    %55 = arith.select %45, %50, %54 : vector<4x2xi1>, vector<4x2xf32>
    %c0_29 = arith.constant 0 : index
    %c0_30 = arith.constant 0 : index
    %c0_31 = arith.constant 0 : index
    %56 = vector.load %arg9[%c0_29, %c0_30, %c0_31] : memref<2x4x2xf32, #tpu.memory_space<vmem>>, vector<1x4x2xf32>
    %57 = vector.shape_cast %56 : vector<1x4x2xf32> to vector<4x2xf32>
    %58 = vector.shape_cast %55 : vector<4x2xf32> to vector<1x4x2xf32>
    tpu.vector_store %arg9[%c0_29, %c0_30, %c0_31], %58 {strides = array<i32>} : memref<2x4x2xf32, #tpu.memory_space<vmem>>, vector<1x4x2xf32>,
    %59 = vector.extract_strided_slice %33 {offsets = [4, 0], sizes = [4, 2], strides = [1, 1]} : vector<8x2xf32> to vector<4x2xf32>
    %c1_i32_32 = arith.constant 1 : i32
    %60 = vector.broadcast %c1_i32_32 : i32 to vector<4x2xi32>
    %61 = arith.cmpi sge, %34, %60 : vector<4x2xi32>
    %62 = arith.mulf %59, %59 : vector<4x2xf32>
    %cst_33 = arith.constant 0.000000e+00 : f32
    %63 = vector.broadcast %cst_33 : f32 to vector<4x2xf32>
    %64 = arith.select %61, %62, %63 : vector<4x2xi1>, vector<4x2xf32>
    %cst_34 = arith.constant dense<0.000000e+00> : vector<2xf32>
    %65 = vector.multi_reduction <add>, %64, %cst_34 [0] : vector<4x2xf32> to vector<2xf32>
    %66 = vector.shape_cast %65 : vector<2xf32> to vector<1x2xf32>
    %67 = math.sqrt %66 : vector<1x2xf32>
    %c0_i32_35 = arith.constant 0 : i32
    %68 = vector.broadcast %c0_i32_35 : i32 to vector<4x2xi32>
    %69 = arith.cmpi eq, %34, %68 : vector<4x2xi32>
    %70 = arith.negf %59 : vector<4x2xf32>
    %71 = math.exp %70 : vector<4x2xf32>
    %cst_36 = arith.constant 1.000000e+00 : f32
    %72 = vector.broadcast %cst_36 : f32 to vector<4x2xf32>
    %73 = arith.addf %72, %71 : vector<4x2xf32>
    %74 = arith.divf %72, %73 : vector<4x2xf32>
    %cst_37 = arith.constant 9.99999997E-7 : f32
    %75 = vector.broadcast %cst_37 : f32 to vector<1x2xf32>
    %76 = arith.addf %67, %75 : vector<1x2xf32>
    %77 = vector.broadcast %76 : vector<1x2xf32> to vector<4x2xf32>
    %78 = arith.divf %59, %77 : vector<4x2xf32>
    %79 = arith.select %69, %74, %78 : vector<4x2xi1>, vector<4x2xf32>
    %c1 = arith.constant 1 : index
    %c0_38 = arith.constant 0 : index
    %c0_39 = arith.constant 0 : index
    %80 = vector.load %arg9[%c1, %c0_38, %c0_39] : memref<2x4x2xf32, #tpu.memory_space<vmem>>, vector<1x4x2xf32>
    %81 = vector.shape_cast %80 : vector<1x4x2xf32> to vector<4x2xf32>
    %82 = vector.shape_cast %79 : vector<4x2xf32> to vector<1x4x2xf32>
    tpu.vector_store %arg9[%c1, %c0_38, %c0_39], %82 {strides = array<i32>} : memref<2x4x2xf32, #tpu.memory_space<vmem>>, vector<1x4x2xf32>,
    return
  }
}

</mosaic_0001>

<bundles_post_ra>
// kernel: posenet_rot_heads_forward.1
= control target key start
LH: loop header
LB: loop body
LE: loop exit
PB: predicated region body
PF: predicated region fallthrough
CT: control target
= control target key end

     0   :  { %v1668_v0 = vmov 0   ;;  %v1669_v8 = vmov 0.0   ;;  %vm272_vm0 = vcmask 523264   ;;  %vm1398_vm1 = vcmask 7168   ;;  %s2389_s0 = inlined_call_operand.vmem [shape: f32[64,256], index: 0, kind: input, shape index: {}]   ;;  %s2390_s2 = inlined_call_operand.vmem [shape: f32[256,1], index: 2, kind: input, shape index: {}]   ;;  %s2391_s1 = inlined_call_operand.vmem [shape: f32[256,64], index: 1, kind: input, shape index: {}]   ;;  %s2392_s4 = inlined_call_operand.vmem [shape: f32[128,1], index: 4, kind: input, shape index: {}]   ;;  %s2393_s6 = inlined_call_operand.vmem [shape: f32[128,1], index: 6, kind: input, shape index: {}]   ;;  %s2394_s8 = inlined_call_operand.vmem [shape: f32[8,1], index: 8, kind: input, shape index: {}]   ;;  %s2395_s3 = inlined_call_operand.vmem [shape: f32[128,256], index: 3, kind: input, shape index: {}]   ;;  %s2396_s5 = inlined_call_operand.vmem [shape: f32[128,128], index: 5, kind: input, shape index: {}]   ;;  %s2397_s7 = inlined_call_operand.vmem [shape: f32[8,128], index: 7, kind: input, shape index: {}]   ;;  %s2398_s9 = inlined_call_operand.vmem [shape: f32[2,4,2], index: 9, kind: output, shape index: {}]  }
   0x1   :  { %1654 = vset.pattern.permute.xlu0 %v1668_v0  ;;  %v33_v1 = vld [vmem:[%s2389_s0 + $0x8] sm:$0xff]  ;;  %v35_v2 = vld [vmem:[%s2389_s0 + $0x18] sm:$0xff]  ;;  %v80_v3 = vld [vmem:[%s2390_s2] sm:$0xff]  ;;  %1655 = vset.pattern.permute.xlu1 %v1668_v0  ;;  %vm1405_vm3 = vcmask 11264  }
   0x2   :  { %v1500_v4 = vpack.c.bf16 %v35_v2, %v33_v1  ;;  %114 = vperm.xlu0 %1654, %v80_v3   ;;  %v32_v5 = vld [vmem:[%s2389_s0] sm:$0xff]  ;;  %v34_v6 = vld [vmem:[%s2389_s0 + $0x10] sm:$0xff]  ;;  %v37_v7 = vld [vmem:[%s2389_s0 + $0x28] sm:$0xff]  ;;  %433 = vmatprep.mubr.f32.mxu0 %v1669_v8 }
   0x3   :  { %v1502_v9 = vpack.c.bf16 %v34_v6, %v32_v5  ;;  %v39_v10 = vld [vmem:[%s2389_s0 + $0x38] sm:$0xff]  ;;  %v81_v11 = vld [vmem:[%s2390_s2 + $0x8] sm:$0xff]  ;;  %v36_v12 = vld [vmem:[%s2389_s0 + $0x20] sm:$0xff]  ;;  %529 = vmatprep.mubr.f32.mxu1 %v1669_v8 }
   0x4   :  { %1501 = vmatprep.subr.bf16.mxu0 %v1500_v4  ;;  %1644 = vmatprep.subr.bf16.mxu1 %v1500_v4  ;;  %v1504_v13 = vpack.c.bf16 %v39_v10, %v37_v7  ;;  %v38_v14 = vld [vmem:[%s2389_s0 + $0x30] sm:$0xff]  ;;  %v41_v15 = vld [vmem:[%s2389_s0 + $0x48] sm:$0xff]  ;;  %v43_v16 = vld [vmem:[%s2389_s0 + $0x58] sm:$0xff] }
   0x5   :  { %1503 = vmatpush1.bf16.msra.mxu0 %v1502_v9  ;;  %1648 = vmatpush1.bf16.msra.mxu1 %v1502_v9  ;;  %v1506_v17 = vpack.c.bf16 %v38_v14, %v36_v12  ;;  %v82_v18 = vld [vmem:[%s2390_s2 + $0x10] sm:$0xff]  ;;  %v1508_v19 = vpack.c.bf16 %v43_v16, %v41_v15  ;;  %v40_v20 = vld [vmem:[%s2389_s0 + $0x40] sm:$0xff]  ;;  %v45_v22 = vld [vmem:[%s2389_s0 + $0x68] sm:$0xff] }
   0x6   :  { %1505 = vmatprep.subr.bf16.mxu0 %v1504_v13  ;;  %1645 = vmatprep.subr.bf16.mxu1 %v1504_v13  ;;  %v42_v21 = vld [vmem:[%s2389_s0 + $0x50] sm:$0xff]  ;;  %v47_v23 = vld [vmem:[%s2389_s0 + $0x78] sm:$0xff]  ;;  %v84_v24 = vld [vmem:[%s2390_s2 + $0x20] sm:$0xff] }
   0x7   :  { %119 = vperm.xlu0 %1654, %v81_v11   ;;  %124 = vperm.xlu1 %1655, %v82_v18   ;;  %v83_v25 = vld [vmem:[%s2390_s2 + $0x18] sm:$0xff]  ;;  %v1510_v26 = vpack.c.bf16 %v42_v21, %v40_v20  ;;  %v1512_v27 = vpack.c.bf16 %v47_v23, %v45_v22  ;;  %v44_v28 = vld [vmem:[%s2389_s0 + $0x60] sm:$0xff]  ;;  %v46_v29 = vld [vmem:[%s2389_s0 + $0x70] sm:$0xff] }
   0x8   :  { %v86_v30 = vld [vmem:[%s2390_s2 + $0x30] sm:$0xff]  ;;  %v85_v31 = vld [vmem:[%s2390_s2 + $0x28] sm:$0xff]  ;;  %v1514_v32 = vpack.c.bf16 %v46_v29, %v44_v28  ;;  %v88_v33 = vld [vmem:[%s2390_s2 + $0x40] sm:$0xff] }
   0x9   :  { %1507 = vmatpush1.bf16.msra.mxu0 %v1506_v17  ;;  %1649 = vmatpush1.bf16.msra.mxu1 %v1506_v17  ;;  %v87_v34 = vld [vmem:[%s2390_s2 + $0x38] sm:$0xff]  ;;  %v48_v35 = vld [vmem:[%s2391_s1] sm:$0xff]  ;;  %v90_v37 = vld [vmem:[%s2390_s2 + $0x50] sm:$0xff] }
   0xa   :  { %1509 = vmatprep.subr.bf16.mxu0 %v1508_v19  ;;  %1646 = vmatprep.subr.bf16.mxu1 %v1508_v19  ;;  %v64_v36 = vld [vmem:[%s2391_s1 + $0x80] sm:$0xff]  ;;  %v89_v38 = vld [vmem:[%s2390_s2 + $0x48] sm:$0xff]  ;;  %v91_v42 = vld [vmem:[%s2390_s2 + $0x58] sm:$0xff] }
   0xb   :  { %134 = vperm.xlu0 %1654, %v84_v24   ;;  %129 = vperm.xlu1 %1655, %v83_v25   ;;  %v49_v39 = vld [vmem:[%s2391_s1 + $0x8] sm:$0xff]  ;;  %v92_v41 = vld [vmem:[%s2390_s2 + $0x60] sm:$0xff]  ;;  %v50_v43 = vld [vmem:[%s2391_s1 + $0x10] sm:$0xff] }
   0xc   :  { %v65_v40 = vld [vmem:[%s2391_s1 + $0x88] sm:$0xff]  ;;  %v66_v44 = vld [vmem:[%s2391_s1 + $0x90] sm:$0xff]  ;;  %v51_v47 = vld [vmem:[%s2391_s1 + $0x18] sm:$0xff] }
   0xd   :  { %1511 = vmatpush1.bf16.msra.mxu0 %v1510_v26  ;;  %1650 = vmatpush1.bf16.msra.mxu1 %v1510_v26  ;;  %v94_v45 = vld [vmem:[%s2390_s2 + $0x70] sm:$0xff]  ;;  %v93_v46 = vld [vmem:[%s2390_s2 + $0x68] sm:$0xff]  ;;  %v67_v48 = vld [vmem:[%s2391_s1 + $0x98] sm:$0xff] }
   0xe   :  { %1513 = vmatprep.subr.bf16.mxu0 %v1512_v27  ;;  %1647 = vmatprep.subr.bf16.mxu1 %v1512_v27  ;;  %v96_v49 = vld [vmem:[%s2390_s2 + $0x80] sm:$0xff]  ;;  %v95_v50 = vld [vmem:[%s2390_s2 + $0x78] sm:$0xff]  ;;  %v98_v53 = vld [vmem:[%s2390_s2 + $0x90] sm:$0xff] }
   0xf   :  { %144 = vperm.xlu0 %1654, %v86_v30   ;;  %139 = vperm.xlu1 %1655, %v85_v31   ;;  %v52_v51 = vld [vmem:[%s2391_s1 + $0x20] sm:$0xff]  ;;  %v97_v54 = vld [vmem:[%s2390_s2 + $0x88] sm:$0xff]  ;;  %v99_v58 = vld [vmem:[%s2390_s2 + $0x98] sm:$0xff] }
  0x10   :  { %v68_v52 = vld [vmem:[%s2391_s1 + $0xa0] sm:$0xff]  ;;  %v53_v55 = vld [vmem:[%s2391_s1 + $0x28] sm:$0xff]  ;;  %v54_v59 = vld [vmem:[%s2391_s1 + $0x30] sm:$0xff] }
  0x11   :  { %1515 = vmatpush1.bf16.msra.mxu0 %v1514_v32  ;;  %1651 = vmatpush1.bf16.msra.mxu1 %v1514_v32  ;;  %v69_v56 = vld [vmem:[%s2391_s1 + $0xa8] sm:$0xff]  ;;  %v100_v57 = vld [vmem:[%s2390_s2 + $0xa0] sm:$0xff]  ;;  %v70_v60 = vld [vmem:[%s2391_s1 + $0xb0] sm:$0xff] }
  0x12   :  { %v102_v61 = vld [vmem:[%s2390_s2 + $0xb0] sm:$0xff]  ;;  %v101_v62 = vld [vmem:[%s2390_s2 + $0xa8] sm:$0xff]  ;;  %v55_v63 = vld [vmem:[%s2391_s1 + $0x38] sm:$0xff] }
  0x13   :  { %154 = vperm.xlu0 %1654, %v88_v33   ;;  %149 = vperm.xlu1 %1655, %v87_v34   ;;  %v71_v0 = vld [vmem:[%s2391_s1 + $0xb8] sm:$0xff]  ;;  %v104_v1 = vld [vmem:[%s2390_s2 + $0xc0] sm:$0xff]  ;;  %v106_v5 = vld [vmem:[%s2390_s2 + $0xd0] sm:$0xff] }
  0x14   :  { %1466 = vmatmul.mubr.msk.f32.vlgmr.msra.gmra.mrb[0].mxu0 %vm272_vm0, %v48_v35  ;;  %1482 = vmatmul.mubr.msk.f32.vlgmr.msra.gmra.mrb[0].mxu1 %vm272_vm0, %v64_v36  ;;  %v103_v2 = vld [vmem:[%s2390_s2 + $0xb8] sm:$0xff]  ;;  %v56_v3 = vld [vmem:[%s2391_s1 + $0x40] sm:$0xff]  ;;  %v105_v6 = vld [vmem:[%s2390_s2 + $0xc8] sm:$0xff] }
  0x15   :  { %439 = vmatprep.mubr.f32.mxu0 %v1669_v8  ;;  %535 = vmatprep.mubr.f32.mxu1 %v1669_v8  ;;  %v72_v4 = vld [vmem:[%s2391_s1 + $0xc0] sm:$0xff]  ;;  %v57_v7 = vld [vmem:[%s2391_s1 + $0x48] sm:$0xff]  ;;  %v107_v11 = vld [vmem:[%s2390_s2 + $0xd8] sm:$0xff] }
  0x16   :  { %v73_v9 = vld [vmem:[%s2391_s1 + $0xc8] sm:$0xff]  ;;  %v108_v10 = vld [vmem:[%s2390_s2 + $0xe0] sm:$0xff]  ;;  %v58_v12 = vld [vmem:[%s2391_s1 + $0x50] sm:$0xff] }
  0x17   :  { %164 = vperm.xlu0 %1654, %v90_v37   ;;  %159 = vperm.xlu1 %1655, %v89_v38   ;;  %v74_v13 = vld [vmem:[%s2391_s1 + $0xd0] sm:$0xff]  ;;  %v109_v15 = vld [vmem:[%s2390_s2 + $0xe8] sm:$0xff]  ;;  %v59_v16 = vld [vmem:[%s2391_s1 + $0x58] sm:$0xff] }
  0x18   :  { %1467 = vmatmul.mubr.msk.f32.gmra.mrb[2].mxu0 %vm272_vm0, %v49_v39  ;;  %1483 = vmatmul.mubr.msk.f32.gmra.mrb[2].mxu1 %vm272_vm0, %v65_v40  ;;  %v110_v14 = vld [vmem:[%s2390_s2 + $0xf0] sm:$0xff]  ;;  %v75_v17 = vld [vmem:[%s2391_s1 + $0xd8] sm:$0xff]  ;;  %v722_v18 = vld [vmem:[%s2392_s4] sm:$0xff] }
  0x19   :  { %445 = vmatprep.mubr.f32.mxu0 %v1669_v8  ;;  %541 = vmatprep.mubr.f32.mxu1 %v1669_v8  ;;  %v111_v19 = vld [vmem:[%s2390_s2 + $0xf8] sm:$0xff]  ;;  %v60_v20 = vld [vmem:[%s2391_s1 + $0x60] sm:$0xff]  ;;  %v724_v22 = vld [vmem:[%s2392_s4 + $0x10] sm:$0xff] }
  0x1a   :  { %v76_v21 = vld [vmem:[%s2391_s1 + $0xe0] sm:$0xff]  ;;  %v723_v23 = vld [vmem:[%s2392_s4 + $0x8] sm:$0xff]  ;;  %v725_v27 = vld [vmem:[%s2392_s4 + $0x18] sm:$0xff] }
  0x1b   :  { %174 = vperm.xlu0 %1654, %v92_v41   ;;  %169 = vperm.xlu1 %1655, %v91_v42   ;;  %v61_v24 = vld [vmem:[%s2391_s1 + $0x68] sm:$0xff]  ;;  %v726_v26 = vld [vmem:[%s2392_s4 + $0x20] sm:$0xff]  ;;  %v62_v28 = vld [vmem:[%s2391_s1 + $0x70] sm:$0xff] }
  0x1c   :  { %1468 = vmatmul.mubr.msk.f32.gmra.mrb[4].mxu0 %vm272_vm0, %v50_v43  ;;  %1484 = vmatmul.mubr.msk.f32.gmra.mrb[4].mxu1 %vm272_vm0, %v66_v44  ;;  %v77_v25 = vld [vmem:[%s2391_s1 + $0xe8] sm:$0xff]  ;;  %v78_v29 = vld [vmem:[%s2391_s1 + $0xf0] sm:$0xff]  ;;  %v63_v32 = vld [vmem:[%s2391_s1 + $0x78] sm:$0xff] }
  0x1d   :  { %451 = vmatprep.mubr.f32.mxu0 %v1669_v8  ;;  %547 = vmatprep.mubr.f32.mxu1 %v1669_v8  ;;  %v728_v30 = vld [vmem:[%s2392_s4 + $0x30] sm:$0xff]  ;;  %v727_v31 = vld [vmem:[%s2392_s4 + $0x28] sm:$0xff]  ;;  %v79_v33 = vld [vmem:[%s2391_s1 + $0xf8] sm:$0xff] }
  0x1e   :  { %v730_v34 = vld [vmem:[%s2392_s4 + $0x40] sm:$0xff]  ;;  %v729_v35 = vld [vmem:[%s2392_s4 + $0x38] sm:$0xff]  ;;  %v732_v36 = vld [vmem:[%s2392_s4 + $0x50] sm:$0xff] }
  0x1f   :  { %184 = vperm.xlu0 %1654, %v94_v45   ;;  %179 = vperm.xlu1 %1655, %v93_v46   ;;  %v731_v37 = vld [vmem:[%s2392_s4 + $0x48] sm:$0xff]  ;;  %v734_v38 = vld [vmem:[%s2392_s4 + $0x60] sm:$0xff]  ;;  %v733_v39 = vld [vmem:[%s2392_s4 + $0x58] sm:$0xff] }
  0x20   :  { %1469 = vmatmul.mubr.msk.f32.gmra.mrb[6].mxu0 %vm272_vm0, %v51_v47  ;;  %1485 = vmatmul.mubr.msk.f32.gmra.mrb[6].mxu1 %vm272_vm0, %v67_v48  ;;  %v736_v40 = vld [vmem:[%s2392_s4 + $0x70] sm:$0xff]  ;;  %v735_v41 = vld [vmem:[%s2392_s4 + $0x68] sm:$0xff]  ;;  %v1027_v42 = vld [vmem:[%s2393_s6] sm:$0xff] }
  0x21   :  { %457 = vmatprep.mubr.f32.mxu0 %v1669_v8  ;;  %553 = vmatprep.mubr.f32.mxu1 %v1669_v8  ;;  %v737_v43 = vld [vmem:[%s2392_s4 + $0x78] sm:$0xff]  ;;  %v1029_v44 = vld [vmem:[%s2393_s6 + $0x10] sm:$0xff]  ;;  %v1028_v45 = vld [vmem:[%s2393_s6 + $0x8] sm:$0xff] }
  0x22   :  { %v1031_v46 = vld [vmem:[%s2393_s6 + $0x20] sm:$0xff]  ;;  %v1030_v47 = vld [vmem:[%s2393_s6 + $0x18] sm:$0xff]  ;;  %v1033_v48 = vld [vmem:[%s2393_s6 + $0x30] sm:$0xff] }
  0x23   :  { %194 = vperm.xlu0 %1654, %v96_v49   ;;  %189 = vperm.xlu1 %1655, %v95_v50   ;;  %v1032_v49 = vld [vmem:[%s2393_s6 + $0x28] sm:$0xff]  ;;  %v1035_v50 = vld [vmem:[%s2393_s6 + $0x40] sm:$0xff] }
  0x24   :  { %1470 = vmatmul.mubr.msk.f32.gmra.mrb[8].mxu0 %vm272_vm0, %v52_v51  ;;  %1486 = vmatmul.mubr.msk.f32.gmra.mrb[8].mxu1 %vm272_vm0, %v68_v52  ;;  %v1034_v51 = vld [vmem:[%s2393_s6 + $0x38] sm:$0xff]  ;;  %v1037_v52 = vld [vmem:[%s2393_s6 + $0x50] sm:$0xff] }
  0x25   :  { %463 = vmatprep.mubr.f32.mxu0 %v1669_v8  ;;  %559 = vmatprep.mubr.f32.mxu1 %v1669_v8 }
  0x27   :  { %204 = vperm.xlu0 %1654, %v98_v53   ;;  %199 = vperm.xlu1 %1655, %v97_v54   ;;  %v1036_v53 = vld [vmem:[%s2393_s6 + $0x48] sm:$0xff]  ;;  %v1039_v54 = vld [vmem:[%s2393_s6 + $0x60] sm:$0xff] }
  0x28   :  { %1471 = vmatmul.mubr.msk.f32.gmra.mrb[10].mxu0 %vm272_vm0, %v53_v55  ;;  %1487 = vmatmul.mubr.msk.f32.gmra.mrb[10].mxu1 %vm272_vm0, %v69_v56  ;;  %v1038_v55 = vld [vmem:[%s2393_s6 + $0x58] sm:$0xff]  ;;  %v1041_v56 = vld [vmem:[%s2393_s6 + $0x70] sm:$0xff] }
  0x29   :  { %469 = vmatprep.mubr.f32.mxu0 %v1669_v8  ;;  %565 = vmatprep.mubr.f32.mxu1 %v1669_v8 }
  0x2b   :  { %214 = vperm.xlu0 %1654, %v100_v57   ;;  %209 = vperm.xlu1 %1655, %v99_v58   ;;  %v1040_v57 = vld [vmem:[%s2393_s6 + $0x68] sm:$0xff]  ;;  %v1317_v58 = vld [vmem:[%s2394_s8] sm:$0xff] }
  0x2c   :  { %1472 = vmatmul.mubr.msk.f32.gmra.mrb[12].mxu0 %vm272_vm0, %v54_v59  ;;  %1488 = vmatmul.mubr.msk.f32.gmra.mrb[12].mxu1 %vm272_vm0, %v70_v60  ;;  %v1042_v59 = vld [vmem:[%s2393_s6 + $0x78] sm:$0xff] }
  0x2d   :  { %475 = vmatprep.mubr.f32.mxu0 %v1669_v8  ;;  %571 = vmatprep.mubr.f32.mxu1 %v1669_v8 }
  0x2f   :  { %224 = vperm.xlu0 %1654, %v102_v61   ;;  %219 = vperm.xlu1 %1655, %v101_v62  }
  0x30   :  { %1473 = vmatmul.mubr.msk.f32.gmra.mrb[14].mxu0 %vm272_vm0, %v55_v63  ;;  %1489 = vmatmul.mubr.msk.f32.gmra.mrb[14].mxu1 %vm272_vm0, %v71_v0 }
  0x31   :  { %481 = vmatprep.mubr.f32.mxu0 %v1669_v8  ;;  %577 = vmatprep.mubr.f32.mxu1 %v1669_v8 }
  0x33   :  { %234 = vperm.xlu0 %1654, %v104_v1   ;;  %229 = vperm.xlu1 %1655, %v103_v2  }
  0x34   :  { %1474 = vmatmul.mubr.msk.f32.gmra.mrb[16].mxu0 %vm272_vm0, %v56_v3  ;;  %1490 = vmatmul.mubr.msk.f32.gmra.mrb[16].mxu1 %vm272_vm0, %v72_v4  ;;  %v691_v4 = vld [vmem:[%s2395_s3 + $0x8] sm:$0xff] }
  0x35   :  { %487 = vmatprep.mubr.f32.mxu0 %v1669_v8  ;;  %583 = vmatprep.mubr.f32.mxu1 %v1669_v8 }
  0x37   :  { %244 = vperm.xlu0 %1654, %v106_v5   ;;  %239 = vperm.xlu1 %1655, %v105_v6  }
  0x38   :  { %1475 = vmatmul.mubr.msk.f32.gmra.mrb[18].mxu0 %vm272_vm0, %v57_v7  ;;  %1491 = vmatmul.mubr.msk.f32.gmra.mrb[18].mxu1 %vm272_vm0, %v73_v9 }
  0x39   :  { %493 = vmatprep.mubr.f32.mxu0 %v1669_v8  ;;  %589 = vmatprep.mubr.f32.mxu1 %v1669_v8 }
  0x3b   :  { %254 = vperm.xlu0 %1654, %v108_v10   ;;  %249 = vperm.xlu1 %1655, %v107_v11  }
  0x3c   :  { %1476 = vmatmul.mubr.msk.f32.gmra.mrb[20].mxu0 %vm272_vm0, %v58_v12  ;;  %1492 = vmatmul.mubr.msk.f32.gmra.mrb[20].mxu1 %vm272_vm0, %v74_v13 }
  0x3d   :  { %499 = vmatprep.mubr.f32.mxu0 %v1669_v8  ;;  %595 = vmatprep.mubr.f32.mxu1 %v1669_v8 }
  0x3f   :  { %264 = vperm.xlu0 %1654, %v110_v14   ;;  %259 = vperm.xlu1 %1655, %v109_v15  }
  0x40   :  { %1477 = vmatmul.mubr.msk.f32.gmra.mrb[22].mxu0 %vm272_vm0, %v59_v16  ;;  %1493 = vmatmul.mubr.msk.f32.gmra.mrb[22].mxu1 %vm272_vm0, %v75_v17 }
  0x41   :  { %505 = vmatprep.mubr.f32.mxu0 %v1669_v8  ;;  %601 = vmatprep.mubr.f32.mxu1 %v1669_v8 }
  0x43   :  { %740 = vperm.xlu0 %1654, %v722_v18   ;;  %269 = vperm.xlu1 %1655, %v111_v19  }
  0x44   :  { %1478 = vmatmul.mubr.msk.f32.gmra.mrb[24].mxu0 %vm272_vm0, %v60_v20  ;;  %1494 = vmatmul.mubr.msk.f32.gmra.mrb[24].mxu1 %vm272_vm0, %v76_v21 }
  0x45   :  { %511 = vmatprep.mubr.f32.mxu0 %v1669_v8  ;;  %607 = vmatprep.mubr.f32.mxu1 %v1669_v8 }
  0x47   :  { %750 = vperm.xlu0 %1654, %v724_v22   ;;  %745 = vperm.xlu1 %1655, %v723_v23  }
  0x48   :  { %1479 = vmatmul.mubr.msk.f32.gmra.mrb[26].mxu0 %vm272_vm0, %v61_v24  ;;  %1495 = vmatmul.mubr.msk.f32.gmra.mrb[26].mxu1 %vm272_vm0, %v77_v25 }
  0x49   :  { %517 = vmatprep.mubr.f32.mxu0 %v1669_v8  ;;  %613 = vmatprep.mubr.f32.mxu1 %v1669_v8 }
  0x4b   :  { %760 = vperm.xlu0 %1654, %v726_v26   ;;  %755 = vperm.xlu1 %1655, %v725_v27  }
  0x4c   :  { %1480 = vmatmul.mubr.msk.f32.gmra.mrb[28].mxu0 %vm272_vm0, %v62_v28  ;;  %1496 = vmatmul.mubr.msk.f32.gmra.mrb[28].mxu1 %vm272_vm0, %v78_v29 }
  0x4d   :  { %523 = vmatprep.mubr.f32.mxu0 %v1669_v8  ;;  %619 = vmatprep.mubr.f32.mxu1 %v1669_v8 }
  0x4f   :  { %770 = vperm.xlu0 %1654, %v728_v30   ;;  %765 = vperm.xlu1 %1655, %v727_v31  }
  0x50   :  { %1481 = vmatmul.mubr.msk.f32.gmra.mrb[30].mxu0 %vm272_vm0, %v63_v32  ;;  %1497 = vmatmul.mubr.msk.f32.gmra.mrb[30].mxu1 %vm272_vm0, %v79_v33 }
  0x51   :  { %1187 = vmatprep.mubr.f32.mxu1 %v1669_v8  ;;  %882 = vmatprep.mubr.f32.mxu0 %v691_v4 }
  0x53   :  { %780 = vperm.xlu0 %1654, %v730_v34   ;;  %775 = vperm.xlu1 %1655, %v729_v35  }
  0x57   :  { %790 = vperm.xlu0 %1654, %v732_v36   ;;  %785 = vperm.xlu1 %1655, %v731_v37  }
  0x5b   :  { %800 = vperm.xlu0 %1654, %v734_v38   ;;  %795 = vperm.xlu1 %1655, %v733_v39  }
  0x5f   :  { %810 = vperm.xlu0 %1654, %v736_v40   ;;  %805 = vperm.xlu1 %1655, %v735_v41  }
  0x63   :  { %1045 = vperm.xlu0 %1654, %v1027_v42   ;;  %815 = vperm.xlu1 %1655, %v737_v43  }
  0x67   :  { %1055 = vperm.xlu0 %1654, %v1029_v44   ;;  %1050 = vperm.xlu1 %1655, %v1028_v45  }
  0x6b   :  { %1065 = vperm.xlu0 %1654, %v1031_v46   ;;  %1060 = vperm.xlu1 %1655, %v1030_v47  }
  0x6f   :  { %1075 = vperm.xlu0 %1654, %v1033_v48   ;;  %1070 = vperm.xlu1 %1655, %v1032_v49  }
  0x73   :  { %1085 = vperm.xlu0 %1654, %v1035_v50   ;;  %1080 = vperm.xlu1 %1655, %v1034_v51  }
  0x77   :  { %1095 = vperm.xlu0 %1654, %v1037_v52   ;;  %1090 = vperm.xlu1 %1655, %v1036_v53  }
  0x7b   :  { %1105 = vperm.xlu0 %1654, %v1039_v54   ;;  %1100 = vperm.xlu1 %1655, %v1038_v55  }
  0x7f   :  { %1115 = vperm.xlu0 %1654, %v1041_v56   ;;  %1110 = vperm.xlu1 %1655, %v1040_v57  }
  0x81   :  { %v115_v60 = vpop.permute.xlu0 %114 }
  0x83   :  { %1320 = vperm.xlu0 %1654, %v1317_v58   ;;  %1120 = vperm.xlu1 %1655, %v1042_v59  }
  0x86   :  { %v125_v61 = vpop.permute.xlu1 %124  ;;  %v120_v62 = vpop.permute.xlu0 %119 }
  0x8a   :  { %v2124_v63 = vpop.permute.xlu1 %129  ;;  %v2126_v0 = vpop.permute.xlu0 %134 }
  0x8e   :  { %v2128_v1 = vpop.permute.xlu1 %139  ;;  %v2130_v2 = vpop.permute.xlu0 %144 }
  0x92   :  { %v2132_v3 = vpop.permute.xlu1 %149  ;;  %v2137_v5 = vpop.permute.xlu0 %154 }
  0x96   :  { %v2139_v6 = vpop.permute.xlu1 %159  ;;  %v2141_v7 = vpop.permute.xlu0 %164 }
  0x9a   :  { %v2143_v9 = vpop.permute.xlu1 %169  ;;  %v2145_v10 = vpop.permute.xlu0 %174 }
  0x9e   :  { %v2147_v11 = vpop.permute.xlu1 %179  ;;  %v2149_v12 = vpop.permute.xlu0 %184 }
  0xa2   :  { %v2151_v13 = vpop.permute.xlu1 %189  ;;  %v195_v14 = vpop.permute.xlu0 %194 }
  0xa6   :  { %v200_v21 = vpop.permute.xlu1 %199  ;;  %v205_v34 = vpop.permute.xlu0 %204 }
  0xaa   :  { %v210_v51 = vpop.permute.xlu1 %209 }
  0xe7   :  { %v435_v15 = vpop.f32.mrb[0].mxu0  ;;  %v531_v16 = vpop.f32.mrb[0].mxu1 }
  0xe8   :  { %v437_v17 = vpop.f32.mrb[1].mxu0  ;;  %v532_v18 = vadd.f32 %v531_v16, %v195_v14  ;;  %v533_v19 = vpop.f32.mrb[1].mxu1  ;;  %v436_v22 = vadd.f32 %v435_v15, %v115_v60 }
  0xe9   :  { %v534_v20 = vadd.f32 %v533_v19, %v195_v14  ;;  %v438_v23 = vadd.f32 %v437_v17, %v115_v60  ;;  %v215_v15 = vpop.permute.xlu0 %214 }
  0xea   :  { %v658_v28 = vmax.f32 %v532_v18, 0.0  ;;  %v626_v35 = vmax.f32 %v436_v22, 0.0 }
  0xeb   :  { %v441_v24 = vpop.f32.mrb[2].mxu0  ;;  %v537_v25 = vpop.f32.mrb[2].mxu1  ;;  %v659_v32 = vmax.f32 %v534_v20, 0.0  ;;  %v627_v38 = vmax.f32 %v438_v23, 0.0 }
  0xec   :  { %v442_v26 = vadd.f32 %v441_v24, %v120_v62  ;;  %v443_v27 = vpop.f32.mrb[3].mxu0  ;;  %v538_v29 = vadd.f32 %v537_v25, %v200_v21  ;;  %v539_v30 = vpop.f32.mrb[3].mxu1 }
  0xed   :  { %v444_v31 = vadd.f32 %v443_v27, %v120_v62  ;;  %v540_v33 = vadd.f32 %v539_v30, %v200_v21  ;;  %v220_v30 = vpop.permute.xlu1 %219 }
  0xee   :  { %v628_v36 = vmax.f32 %v442_v26, 0.0  ;;  %v660_v37 = vmax.f32 %v538_v29, 0.0 }
  0xef   :  { %v629_v39 = vmax.f32 %v444_v31, 0.0  ;;  %v447_v40 = vpop.f32.mrb[4].mxu0  ;;  %v661_v41 = vmax.f32 %v540_v33, 0.0  ;;  %v543_v42 = vpop.f32.mrb[4].mxu1 }
  0xf0   :  { %v1518_v43 = vpack.c.bf16 %v628_v36, %v626_v35  ;;  %v449_v44 = vpop.f32.mrb[5].mxu0  ;;  %v2153_v45 = vpack.c.bf16 %v660_v37, %v658_v28  ;;  %v544_v46 = vadd.f32 %v543_v42, %v205_v34  ;;  %v545_v47 = vpop.f32.mrb[5].mxu1  ;;  %v448_v52 = vadd.f32 %v447_v40, %v125_v61 }
  0xf1   :  { %v1516_v48 = vpack.c.bf16 %v629_v39, %v627_v38  ;;  %v2155_v49 = vpack.c.bf16 %v661_v41, %v659_v32  ;;  %v546_v50 = vadd.f32 %v545_v47, %v205_v34  ;;  %v450_v53 = vadd.f32 %v449_v44, %v125_v61 }
  0xf2   :  { %v662_v58 = vmax.f32 %v544_v46, 0.0  ;;  %v630_v16 = vmax.f32 %v448_v52, 0.0 }
  0xf3   :  { %v453_v54 = vpop.f32.mrb[6].mxu0  ;;  %1517 = vmatprep.subr.bf16.mxu0 %v1516_v48  ;;  %v549_v55 = vpop.f32.mrb[6].mxu1  ;;  %v663_v4 = vmax.f32 %v546_v50, 0.0  ;;  %v631_v19 = vmax.f32 %v450_v53, 0.0 }
  0xf4   :  { %v454_v56 = vadd.f32 %v453_v54, %v2124_v63  ;;  %v455_v57 = vpop.f32.mrb[7].mxu0  ;;  %1519 = vmatpush1.bf16.msra.mxu0 %v1518_v43  ;;  %v550_v59 = vadd.f32 %v549_v55, %v210_v51  ;;  %v551_v60 = vpop.f32.mrb[7].mxu1 }
  0xf5   :  { %v456_v62 = vadd.f32 %v455_v57, %v2124_v63  ;;  %v552_v14 = vadd.f32 %v551_v60, %v210_v51  ;;  %v225_v43 = vpop.permute.xlu0 %224  ;;  %v230_v60 = vpop.permute.xlu1 %229 }
  0xf6   :  { %v632_v17 = vmax.f32 %v454_v56, 0.0  ;;  %v664_v18 = vmax.f32 %v550_v59, 0.0 }
  0xf7   :  { %v633_v61 = vmax.f32 %v456_v62, 0.0  ;;  %v459_v20 = vpop.f32.mrb[8].mxu0  ;;  %v665_v21 = vmax.f32 %v552_v14, 0.0  ;;  %v555_v22 = vpop.f32.mrb[8].mxu1 }
  0xf8   :  { %v1522_v23 = vpack.c.bf16 %v632_v17, %v630_v16  ;;  %v461_v24 = vpop.f32.mrb[9].mxu0  ;;  %v2159_v25 = vpack.c.bf16 %v664_v18, %v662_v58  ;;  %v556_v26 = vadd.f32 %v555_v22, %v215_v15  ;;  %v557_v27 = vpop.f32.mrb[9].mxu1  ;;  %v460_v31 = vadd.f32 %v459_v20, %v2126_v0 }
  0xf9   :  { %v1520_v28 = vpack.c.bf16 %v633_v61, %v631_v19  ;;  %v2161_v29 = vpack.c.bf16 %v665_v21, %v663_v4  ;;  %v558_v63 = vadd.f32 %v557_v27, %v215_v15  ;;  %v462_v32 = vadd.f32 %v461_v24, %v2126_v0 }
  0xfa   :  { %v666_v37 = vmax.f32 %v556_v26, 0.0  ;;  %v634_v44 = vmax.f32 %v460_v31, 0.0 }
  0xfb   :  { %v465_v33 = vpop.f32.mrb[10].mxu0  ;;  %1521 = vmatprep.subr.bf16.mxu0 %v1520_v28  ;;  %v561_v34 = vpop.f32.mrb[10].mxu1  ;;  %v667_v41 = vmax.f32 %v558_v63, 0.0  ;;  %v635_v48 = vmax.f32 %v462_v32, 0.0 }
  0xfc   :  { %v466_v35 = vadd.f32 %v465_v33, %v2128_v1  ;;  %v467_v36 = vpop.f32.mrb[11].mxu0  ;;  %1523 = vmatpush1.bf16.msra.mxu0 %v1522_v23  ;;  %v562_v38 = vadd.f32 %v561_v34, %v220_v30  ;;  %v563_v39 = vpop.f32.mrb[11].mxu1 }
  0xfd   :  { %v468_v40 = vadd.f32 %v467_v36, %v2128_v1  ;;  %v564_v42 = vadd.f32 %v563_v39, %v220_v30 }
  0xfe   :  { %v636_v46 = vmax.f32 %v466_v35, 0.0  ;;  %v668_v47 = vmax.f32 %v562_v38, 0.0  ;;  %v235_v35 = vpop.permute.xlu0 %234  ;;  %v240_v38 = vpop.permute.xlu1 %239 }
  0xff   :  { %v637_v0 = vmax.f32 %v468_v40, 0.0  ;;  %v471_v50 = vpop.f32.mrb[12].mxu0  ;;  %v669_v51 = vmax.f32 %v564_v42, 0.0  ;;  %v567_v52 = vpop.f32.mrb[12].mxu1 }
 0x100   :  { %v1526_v53 = vpack.c.bf16 %v636_v46, %v634_v44  ;;  %v2167_v54 = vpack.c.bf16 %v668_v47, %v666_v37  ;;  %v473_v55 = vpop.f32.mrb[13].mxu0  ;;  %v568_v56 = vadd.f32 %v567_v52, %v225_v43  ;;  %v569_v57 = vpop.f32.mrb[13].mxu1  ;;  %v472_v62 = vadd.f32 %v471_v50, %v2130_v2 }
 0x101   :  { %v1524_v58 = vpack.c.bf16 %v637_v0, %v635_v48  ;;  %v2169_v59 = vpack.c.bf16 %v669_v51, %v667_v41  ;;  %v570_v1 = vadd.f32 %v569_v57, %v225_v43  ;;  %v474_v4 = vadd.f32 %v473_v55, %v2130_v2 }
 0x102   :  { %v670_v16 = vmax.f32 %v568_v56, 0.0  ;;  %v638_v23 = vmax.f32 %v472_v62, 0.0 }
 0x103   :  { %v477_v14 = vpop.f32.mrb[14].mxu0  ;;  %v573_v15 = vpop.f32.mrb[14].mxu1  ;;  %1525 = vmatprep.subr.bf16.mxu0 %v1524_v58  ;;  %v671_v20 = vmax.f32 %v570_v1, 0.0  ;;  %v639_v27 = vmax.f32 %v474_v4, 0.0 }
 0x104   :  { %v478_v17 = vadd.f32 %v477_v14, %v2132_v3  ;;  %v574_v18 = vadd.f32 %v573_v15, %v230_v60  ;;  %v479_v19 = vpop.f32.mrb[15].mxu0  ;;  %v575_v61 = vpop.f32.mrb[15].mxu1  ;;  %1527 = vmatpush1.bf16.msra.mxu0 %v1526_v53 }
 0x105   :  { %v480_v21 = vadd.f32 %v479_v19, %v2132_v3  ;;  %v576_v22 = vadd.f32 %v575_v61, %v230_v60 }
 0x106   :  { %v640_v24 = vmax.f32 %v478_v17, 0.0  ;;  %v672_v26 = vmax.f32 %v574_v18, 0.0 }
 0x107   :  { %v641_v28 = vmax.f32 %v480_v21, 0.0  ;;  %v673_v2 = vmax.f32 %v576_v22, 0.0  ;;  %v483_v63 = vpop.f32.mrb[16].mxu0  ;;  %v579_v30 = vpop.f32.mrb[16].mxu1 }
 0x108   :  { %v1530_v31 = vpack.c.bf16 %v640_v24, %v638_v23  ;;  %v2175_v32 = vpack.c.bf16 %v672_v26, %v670_v16  ;;  %v485_v33 = vpop.f32.mrb[17].mxu0  ;;  %v581_v34 = vpop.f32.mrb[17].mxu1  ;;  %v484_v3 = vadd.f32 %v483_v63, %v2137_v5  ;;  %v580_v39 = vadd.f32 %v579_v30, %v235_v35 }
 0x109   :  { %v1528_v36 = vpack.c.bf16 %v641_v28, %v639_v27  ;;  %v2177_v37 = vpack.c.bf16 %v673_v2, %v671_v20  ;;  %v486_v40 = vadd.f32 %v485_v33, %v2137_v5  ;;  %v582_v41 = vadd.f32 %v581_v34, %v235_v35  ;;  %v245_v16 = vpop.permute.xlu0 %244 }
 0x10a   :  { %v642_v51 = vmax.f32 %v484_v3, 0.0  ;;  %v674_v52 = vmax.f32 %v580_v39, 0.0 }
 0x10b   :  { %v489_v42 = vpop.f32.mrb[18].mxu0  ;;  %v585_v43 = vpop.f32.mrb[18].mxu1  ;;  %1529 = vmatprep.subr.bf16.mxu0 %v1528_v36  ;;  %v643_v56 = vmax.f32 %v486_v40, 0.0  ;;  %v675_v57 = vmax.f32 %v582_v41, 0.0 }
 0x10c   :  { %v490_v44 = vadd.f32 %v489_v42, %v2139_v6  ;;  %v586_v46 = vadd.f32 %v585_v43, %v240_v38  ;;  %v491_v47 = vpop.f32.mrb[19].mxu0  ;;  %v587_v48 = vpop.f32.mrb[19].mxu1  ;;  %1531 = vmatpush1.bf16.msra.mxu0 %v1530_v31 }
 0x10d   :  { %v492_v0 = vadd.f32 %v491_v47, %v2139_v6  ;;  %v588_v50 = vadd.f32 %v587_v48, %v240_v38  ;;  %v250_v6 = vpop.permute.xlu1 %249 }
 0x10e   :  { %v644_v53 = vmax.f32 %v490_v44, 0.0  ;;  %v676_v55 = vmax.f32 %v586_v46, 0.0  ;;  %v255_v44 = vpop.permute.xlu0 %254 }
 0x10f   :  { %v645_v5 = vmax.f32 %v492_v0, 0.0  ;;  %v677_v58 = vmax.f32 %v588_v50, 0.0  ;;  %v495_v1 = vpop.f32.mrb[20].mxu0  ;;  %v591_v60 = vpop.f32.mrb[20].mxu1 }
 0x110   :  { %v1534_v62 = vpack.c.bf16 %v644_v53, %v642_v51  ;;  %v2183_v4 = vpack.c.bf16 %v676_v55, %v674_v52  ;;  %v497_v14 = vpop.f32.mrb[21].mxu0  ;;  %v593_v15 = vpop.f32.mrb[21].mxu1  ;;  %v496_v19 = vadd.f32 %v495_v1, %v2141_v7  ;;  %v592_v61 = vadd.f32 %v591_v60, %v245_v16 }
 0x111   :  { %v1532_v17 = vpack.c.bf16 %v645_v5, %v643_v56  ;;  %v2185_v18 = vpack.c.bf16 %v677_v58, %v675_v57  ;;  %v498_v20 = vadd.f32 %v497_v14, %v2141_v7  ;;  %v594_v21 = vadd.f32 %v593_v15, %v245_v16 }
 0x112   :  { %v646_v30 = vmax.f32 %v496_v19, 0.0  ;;  %v678_v31 = vmax.f32 %v592_v61, 0.0 }
 0x113   :  { %v501_v22 = vpop.f32.mrb[22].mxu0  ;;  %v597_v23 = vpop.f32.mrb[22].mxu1  ;;  %1533 = vmatprep.subr.bf16.mxu0 %v1532_v17  ;;  %v647_v35 = vmax.f32 %v498_v20, 0.0  ;;  %v679_v36 = vmax.f32 %v594_v21, 0.0 }
 0x114   :  { %v502_v24 = vadd.f32 %v501_v22, %v2143_v9  ;;  %v598_v26 = vadd.f32 %v597_v23, %v250_v6  ;;  %v503_v27 = vpop.f32.mrb[23].mxu0  ;;  %v599_v28 = vpop.f32.mrb[23].mxu1  ;;  %1535 = vmatpush1.bf16.msra.mxu0 %v1534_v62 }
 0x115   :  { %v504_v2 = vadd.f32 %v503_v27, %v2143_v9  ;;  %v600_v63 = vadd.f32 %v599_v28, %v250_v6  ;;  %v260_v9 = vpop.permute.xlu1 %259 }
 0x116   :  { %v648_v33 = vmax.f32 %v502_v24, 0.0  ;;  %v680_v34 = vmax.f32 %v598_v26, 0.0  ;;  %v265_v24 = vpop.permute.xlu0 %264 }
 0x117   :  { %v649_v7 = vmax.f32 %v504_v2, 0.0  ;;  %v681_v38 = vmax.f32 %v600_v63, 0.0  ;;  %v507_v3 = vpop.f32.mrb[24].mxu0  ;;  %v603_v39 = vpop.f32.mrb[24].mxu1 }
 0x118   :  { %v1538_v40 = vpack.c.bf16 %v648_v33, %v646_v30  ;;  %v2191_v41 = vpack.c.bf16 %v680_v34, %v678_v31  ;;  %v509_v42 = vpop.f32.mrb[25].mxu0  ;;  %v605_v43 = vpop.f32.mrb[25].mxu1  ;;  %v508_v48 = vadd.f32 %v507_v3, %v2145_v10  ;;  %v604_v0 = vadd.f32 %v603_v39, %v255_v44 }
 0x119   :  { %v1536_v46 = vpack.c.bf16 %v649_v7, %v647_v35  ;;  %v2193_v47 = vpack.c.bf16 %v681_v38, %v679_v36  ;;  %v510_v50 = vadd.f32 %v509_v42, %v2145_v10  ;;  %v606_v51 = vadd.f32 %v605_v43, %v255_v44  ;;  %v270_v28 = vpop.permute.xlu1 %269 }
 0x11a   :  { %v650_v60 = vmax.f32 %v508_v48, 0.0  ;;  %v682_v62 = vmax.f32 %v604_v0, 0.0 }
 0x11b   :  { %v513_v52 = vpop.f32.mrb[26].mxu0  ;;  %v609_v53 = vpop.f32.mrb[26].mxu1  ;;  %1537 = vmatprep.subr.bf16.mxu0 %v1536_v46  ;;  %v651_v16 = vmax.f32 %v510_v50, 0.0  ;;  %v683_v17 = vmax.f32 %v606_v51, 0.0 }
 0x11c   :  { %v514_v55 = vadd.f32 %v513_v52, %v2147_v11  ;;  %v610_v56 = vadd.f32 %v609_v53, %v260_v9  ;;  %v515_v57 = vpop.f32.mrb[27].mxu0  ;;  %v611_v5 = vpop.f32.mrb[27].mxu1  ;;  %1539 = vmatpush1.bf16.msra.mxu0 %v1538_v40  ;;  %v705_v52 = vld [vmem:[%s2395_s3 + $0x78] sm:$0xff]  ;;  %v704_v53 = vld [vmem:[%s2395_s3 + $0x70] sm:$0xff] }
 0x11d   :  { %v516_v58 = vadd.f32 %v515_v57, %v2147_v11  ;;  %v612_v1 = vadd.f32 %v611_v5, %v260_v9  ;;  %v709_v57 = vld [vmem:[%s2395_s3 + $0x98] sm:$0xff]  ;;  %v708_v5 = vld [vmem:[%s2395_s3 + $0x90] sm:$0xff] }
 0x11e   :  { %v652_v14 = vmax.f32 %v514_v55, 0.0  ;;  %v684_v15 = vmax.f32 %v610_v56, 0.0  ;;  %v707_v55 = vld [vmem:[%s2395_s3 + $0x88] sm:$0xff]  ;;  %v706_v56 = vld [vmem:[%s2395_s3 + $0x80] sm:$0xff] }
 0x11f   :  { %v653_v10 = vmax.f32 %v516_v58, 0.0  ;;  %v685_v6 = vmax.f32 %v612_v1, 0.0  ;;  %v519_v19 = vpop.f32.mrb[28].mxu0  ;;  %v615_v61 = vpop.f32.mrb[28].mxu1  ;;  %v711_v58 = vld [vmem:[%s2395_s3 + $0xa8] sm:$0xff]  ;;  %v710_v1 = vld [vmem:[%s2395_s3 + $0xa0] sm:$0xff] }
 0x120   :  { %v1542_v20 = vpack.c.bf16 %v652_v14, %v650_v60  ;;  %v1574_v21 = vpack.c.bf16 %v684_v15, %v682_v62  ;;  %v521_v22 = vpop.f32.mrb[29].mxu0  ;;  %v617_v23 = vpop.f32.mrb[29].mxu1  ;;  %v520_v11 = vadd.f32 %v519_v19, %v2149_v12  ;;  %v616_v2 = vadd.f32 %v615_v61, %v265_v24  ;;  %v713_v60 = vld [vmem:[%s2395_s3 + $0xb8] sm:$0xff]  ;;  %v712_v62 = vld [vmem:[%s2395_s3 + $0xb0] sm:$0xff]  ;;  %v715_v14 = vld [vmem:[%s2395_s3 + $0xc8] sm:$0xff] }
 0x121   :  { %v1540_v26 = vpack.c.bf16 %v653_v10, %v651_v16  ;;  %v1572_v27 = vpack.c.bf16 %v685_v6, %v683_v17  ;;  %v522_v63 = vadd.f32 %v521_v22, %v2149_v12  ;;  %v618_v30 = vadd.f32 %v617_v23, %v265_v24  ;;  %v714_v15 = vld [vmem:[%s2395_s3 + $0xc0] sm:$0xff]  ;;  %v717_v16 = vld [vmem:[%s2395_s3 + $0xd8] sm:$0xff]  ;;  %v716_v17 = vld [vmem:[%s2395_s3 + $0xd0] sm:$0xff]  ;;  %v741_v22 = vpop.permute.xlu0 %740  ;;  %v746_v24 = vpop.permute.xlu1 %745 }
 0x122   :  { %v654_v39 = vmax.f32 %v520_v11, 0.0  ;;  %v686_v40 = vmax.f32 %v616_v2, 0.0  ;;  %v719_v10 = vld [vmem:[%s2395_s3 + $0xe8] sm:$0xff]  ;;  %v718_v6 = vld [vmem:[%s2395_s3 + $0xe0] sm:$0xff]  ;;  %v721_v19 = vld [vmem:[%s2395_s3 + $0xf8] sm:$0xff] }
 0x123   :  { %v525_v31 = vpop.f32.mrb[30].mxu0  ;;  %v621_v33 = vpop.f32.mrb[30].mxu1  ;;  %1541 = vmatprep.subr.bf16.mxu0 %v1540_v26  ;;  %v655_v44 = vmax.f32 %v522_v63, 0.0  ;;  %v687_v46 = vmax.f32 %v618_v30, 0.0  ;;  %v720_v61 = vld [vmem:[%s2395_s3 + $0xf0] sm:$0xff] }
 0x124   :  { %v526_v34 = vadd.f32 %v525_v31, %v2151_v13  ;;  %v622_v35 = vadd.f32 %v621_v33, %v270_v28  ;;  %v527_v36 = vpop.f32.mrb[31].mxu0  ;;  %v623_v7 = vpop.f32.mrb[31].mxu1  ;;  %1543 = vmatpush1.bf16.msra.mxu0 %v1542_v20 }
 0x125   :  { %v528_v38 = vadd.f32 %v527_v36, %v2151_v13  ;;  %v624_v3 = vadd.f32 %v623_v7, %v270_v28  ;;  %v690_v13 = vld [vmem:[%s2395_s3] sm:$0xff]  ;;  %v751_v7 = vpop.permute.xlu0 %750 }
 0x126   :  { %v656_v42 = vmax.f32 %v526_v34, 0.0  ;;  %v688_v43 = vmax.f32 %v622_v35, 0.0 }
 0x127   :  { %v657_v12 = vmax.f32 %v528_v38, 0.0  ;;  %v689_v9 = vmax.f32 %v624_v3, 0.0 }
 0x128   :  { %v1546_v48 = vpack.c.bf16 %v656_v42, %v654_v39  ;;  %v1578_v0 = vpack.c.bf16 %v688_v43, %v686_v40  ;;  %v756_v39 = vpop.permute.xlu1 %755 }
 0x129   :  { %v1544_v50 = vpack.c.bf16 %v657_v12, %v655_v44  ;;  %v1576_v51 = vpack.c.bf16 %v689_v9, %v687_v46 }
 0x12b   :  { %1545 = vmatprep.subr.bf16.mxu0 %v1544_v50 }
 0x12c   :  { %1547 = vmatpush1.bf16.msra.mxu0 %v1546_v48 }
 0x12d   :  { %1549 = vmatprep.subr.bf16.mxu0 %v2155_v49  ;;  %v692_v49 = vld [vmem:[%s2395_s3 + $0x10] sm:$0xff] }
 0x130   :  { %1551 = vmatpush1.bf16.msra.mxu0 %v2153_v45  ;;  %v693_v45 = vld [vmem:[%s2395_s3 + $0x18] sm:$0xff] }
 0x131   :  { %1553 = vmatprep.subr.bf16.mxu0 %v2161_v29  ;;  %v694_v29 = vld [vmem:[%s2395_s3 + $0x20] sm:$0xff] }
 0x134   :  { %1555 = vmatpush1.bf16.msra.mxu0 %v2159_v25  ;;  %v695_v25 = vld [vmem:[%s2395_s3 + $0x28] sm:$0xff] }
 0x135   :  { %1557 = vmatprep.subr.bf16.mxu0 %v2169_v59  ;;  %v696_v59 = vld [vmem:[%s2395_s3 + $0x30] sm:$0xff] }
 0x138   :  { %1559 = vmatpush1.bf16.msra.mxu0 %v2167_v54  ;;  %v697_v54 = vld [vmem:[%s2395_s3 + $0x38] sm:$0xff] }
 0x139   :  { %1561 = vmatprep.subr.bf16.mxu0 %v2177_v37  ;;  %v698_v37 = vld [vmem:[%s2395_s3 + $0x40] sm:$0xff] }
 0x13c   :  { %1563 = vmatpush1.bf16.msra.mxu0 %v2175_v32  ;;  %v699_v32 = vld [vmem:[%s2395_s3 + $0x48] sm:$0xff] }
 0x13d   :  { %1565 = vmatprep.subr.bf16.mxu0 %v2185_v18  ;;  %v700_v18 = vld [vmem:[%s2395_s3 + $0x50] sm:$0xff] }
 0x140   :  { %1567 = vmatpush1.bf16.msra.mxu0 %v2183_v4  ;;  %v701_v4 = vld [vmem:[%s2395_s3 + $0x58] sm:$0xff] }
 0x141   :  { %1569 = vmatprep.subr.bf16.mxu0 %v2193_v47  ;;  %v702_v47 = vld [vmem:[%s2395_s3 + $0x60] sm:$0xff] }
 0x144   :  { %1571 = vmatpush1.bf16.msra.mxu0 %v2191_v41  ;;  %v703_v41 = vld [vmem:[%s2395_s3 + $0x68] sm:$0xff] }
 0x145   :  { %1573 = vmatprep.subr.bf16.mxu0 %v1572_v27 }
 0x148   :  { %1575 = vmatpush1.bf16.msra.mxu0 %v1574_v21 }
 0x149   :  { %1577 = vmatprep.subr.bf16.mxu0 %v1576_v51 }
 0x14c   :  { %1579 = vmatpush1.bf16.msra.mxu0 %v1578_v0 }
 0x14f   :  { %883 = vmatmul.mubr.f32.vlgmr.msra.gmra.mrb[32].mxu0 %v690_v13 }
 0x150   :  { %888 = vmatprep.mubr.f32.mxu0 %v693_v45  ;;  %v761_v45 = vpop.permute.xlu0 %760 }
 0x153   :  { %889 = vmatmul.mubr.f32.gmra.mrb[34].mxu0 %v692_v49 }
 0x154   :  { %894 = vmatprep.mubr.f32.mxu0 %v695_v25 }
 0x157   :  { %895 = vmatmul.mubr.f32.gmra.mrb[36].mxu0 %v694_v29  ;;  %v766_v29 = vpop.permute.xlu1 %765 }
 0x158   :  { %900 = vmatprep.mubr.f32.mxu0 %v697_v54 }
 0x15b   :  { %901 = vmatmul.mubr.f32.gmra.mrb[38].mxu0 %v696_v59 }
 0x15c   :  { %906 = vmatprep.mubr.f32.mxu0 %v699_v32 }
 0x15f   :  { %907 = vmatmul.mubr.f32.gmra.mrb[40].mxu0 %v698_v37 }
 0x160   :  { %912 = vmatprep.mubr.f32.mxu0 %v701_v4 }
 0x163   :  { %913 = vmatmul.mubr.f32.gmra.mrb[42].mxu0 %v700_v18 }
 0x164   :  { %918 = vmatprep.mubr.f32.mxu0 %v703_v41 }
 0x167   :  { %919 = vmatmul.mubr.f32.gmra.mrb[44].mxu0 %v702_v47 }
 0x168   :  { %924 = vmatprep.mubr.f32.mxu0 %v705_v52 }
 0x16b   :  { %925 = vmatmul.mubr.f32.gmra.mrb[46].mxu0 %v704_v53 }
 0x16c   :  { %930 = vmatprep.mubr.f32.mxu0 %v707_v55 }
 0x16f   :  { %931 = vmatmul.mubr.f32.gmra.mrb[48].mxu0 %v706_v56 }
 0x170   :  { %936 = vmatprep.mubr.f32.mxu0 %v709_v57  ;;  %v771_v57 = vpop.permute.xlu0 %770 }
 0x173   :  { %937 = vmatmul.mubr.f32.gmra.mrb[50].mxu0 %v708_v5 }
 0x174   :  { %942 = vmatprep.mubr.f32.mxu0 %v711_v58 }
 0x177   :  { %943 = vmatmul.mubr.f32.gmra.mrb[52].mxu0 %v710_v1  ;;  %v776_v1 = vpop.permute.xlu1 %775 }
 0x178   :  { %948 = vmatprep.mubr.f32.mxu0 %v713_v60 }
 0x17b   :  { %949 = vmatmul.mubr.f32.gmra.mrb[54].mxu0 %v712_v62 }
 0x17c   :  { %954 = vmatprep.mubr.f32.mxu0 %v715_v14 }
 0x17f   :  { %955 = vmatmul.mubr.f32.gmra.mrb[56].mxu0 %v714_v15 }
 0x180   :  { %960 = vmatprep.mubr.f32.mxu0 %v717_v16 }
 0x183   :  { %961 = vmatmul.mubr.f32.gmra.mrb[58].mxu0 %v716_v17 }
 0x184   :  { %966 = vmatprep.mubr.f32.mxu0 %v719_v10 }
 0x187   :  { %967 = vmatmul.mubr.f32.gmra.mrb[60].mxu0 %v718_v6 }
 0x188   :  { %972 = vmatprep.mubr.f32.mxu0 %v721_v19 }
 0x18b   :  { %973 = vmatmul.mubr.f32.gmra.mrb[62].mxu0 %v720_v61 }
 0x18c   :  { %1387 = vmatprep.mubr.f32.mxu0 %v1669_v8 }
 0x222   :  { %v884_v20 = vpop.f32.mrb[32].mxu0 }
 0x223   :  { %v886_v21 = vpop.f32.mrb[33].mxu0  ;;  %v885_v23 = vadd.f32 %v884_v20, %v741_v22 }
 0x224   :  { %v887_v26 = vadd.f32 %v886_v21, %v741_v22  ;;  %v781_v22 = vpop.permute.xlu0 %780 }
 0x225   :  { %v979_v63 = vmax.f32 %v885_v23, 0.0 }
 0x226   :  { %v890_v27 = vpop.f32.mrb[34].mxu0  ;;  %v980_v31 = vmax.f32 %v887_v26, 0.0  ;;  %v786_v26 = vpop.permute.xlu1 %785 }
 0x227   :  { %v891_v28 = vadd.f32 %v890_v27, %v746_v24  ;;  %v892_v11 = vpop.f32.mrb[35].mxu0 }
 0x228   :  { %v893_v2 = vadd.f32 %v892_v11, %v746_v24 }
 0x229   :  { %v981_v30 = vmax.f32 %v891_v28, 0.0 }
 0x22a   :  { %v982_v33 = vmax.f32 %v893_v2, 0.0  ;;  %v896_v34 = vpop.f32.mrb[36].mxu0 }
 0x22b   :  { %v1582_v35 = vpack.c.bf16 %v981_v30, %v979_v63  ;;  %v898_v36 = vpop.f32.mrb[37].mxu0  ;;  %v897_v3 = vadd.f32 %v896_v34, %v751_v7 }
 0x22c   :  { %v1580_v38 = vpack.c.bf16 %v982_v33, %v980_v31  ;;  %v899_v40 = vadd.f32 %v898_v36, %v751_v7 }
 0x22d   :  { %v983_v12 = vmax.f32 %v897_v3, 0.0 }
 0x22e   :  { %v902_v42 = vpop.f32.mrb[38].mxu0  ;;  %1581 = vmatprep.subr.bf16.mxu1 %v1580_v38  ;;  %v984_v48 = vmax.f32 %v899_v40, 0.0  ;;  %v791_v38 = vpop.permute.xlu0 %790 }
 0x22f   :  { %v903_v43 = vadd.f32 %v902_v42, %v756_v39  ;;  %v904_v44 = vpop.f32.mrb[39].mxu0  ;;  %1583 = vmatpush1.bf16.msra.mxu1 %v1582_v35  ;;  %v796_v40 = vpop.permute.xlu1 %795 }
 0x230   :  { %v905_v46 = vadd.f32 %v904_v44, %v756_v39 }
 0x231   :  { %v985_v9 = vmax.f32 %v903_v43, 0.0 }
 0x232   :  { %v986_v0 = vmax.f32 %v905_v46, 0.0  ;;  %v908_v50 = vpop.f32.mrb[40].mxu0 }
 0x233   :  { %v1586_v51 = vpack.c.bf16 %v985_v9, %v983_v12  ;;  %v910_v13 = vpop.f32.mrb[41].mxu0  ;;  %v909_v25 = vadd.f32 %v908_v50, %v761_v45 }
 0x234   :  { %v1584_v49 = vpack.c.bf16 %v986_v0, %v984_v48  ;;  %v911_v54 = vadd.f32 %v910_v13, %v761_v45 }
 0x235   :  { %v987_v18 = vmax.f32 %v909_v25, 0.0 }
 0x236   :  { %v914_v59 = vpop.f32.mrb[42].mxu0  ;;  %1585 = vmatprep.subr.bf16.mxu1 %v1584_v49  ;;  %v988_v47 = vmax.f32 %v911_v54, 0.0  ;;  %v801_v49 = vpop.permute.xlu0 %800 }
 0x237   :  { %v915_v32 = vadd.f32 %v914_v59, %v766_v29  ;;  %v916_v37 = vpop.f32.mrb[43].mxu0  ;;  %1587 = vmatpush1.bf16.msra.mxu1 %v1586_v51  ;;  %v806_v54 = vpop.permute.xlu1 %805 }
 0x238   :  { %v917_v4 = vadd.f32 %v916_v37, %v766_v29 }
 0x239   :  { %v989_v41 = vmax.f32 %v915_v32, 0.0 }
 0x23a   :  { %v990_v52 = vmax.f32 %v917_v4, 0.0  ;;  %v920_v53 = vpop.f32.mrb[44].mxu0 }
 0x23b   :  { %v1590_v55 = vpack.c.bf16 %v989_v41, %v987_v18  ;;  %v922_v56 = vpop.f32.mrb[45].mxu0  ;;  %v921_v58 = vadd.f32 %v920_v53, %v771_v57 }
 0x23c   :  { %v1588_v5 = vpack.c.bf16 %v990_v52, %v988_v47  ;;  %v923_v60 = vadd.f32 %v922_v56, %v771_v57 }
 0x23d   :  { %v991_v17 = vmax.f32 %v921_v58, 0.0 }
 0x23e   :  { %v926_v62 = vpop.f32.mrb[46].mxu0  ;;  %1589 = vmatprep.subr.bf16.mxu1 %v1588_v5  ;;  %v992_v6 = vmax.f32 %v923_v60, 0.0  ;;  %v811_v5 = vpop.permute.xlu0 %810 }
 0x23f   :  { %v927_v14 = vadd.f32 %v926_v62, %v776_v1  ;;  %v928_v15 = vpop.f32.mrb[47].mxu0  ;;  %1591 = vmatpush1.bf16.msra.mxu1 %v1590_v55  ;;  %v816_v60 = vpop.permute.xlu1 %815 }
 0x240   :  { %v929_v16 = vadd.f32 %v928_v15, %v776_v1 }
 0x241   :  { %v993_v10 = vmax.f32 %v927_v14, 0.0 }
 0x242   :  { %v994_v19 = vmax.f32 %v929_v16, 0.0  ;;  %v932_v61 = vpop.f32.mrb[48].mxu0 }
 0x243   :  { %v1594_v20 = vpack.c.bf16 %v993_v10, %v991_v17  ;;  %v934_v21 = vpop.f32.mrb[49].mxu0  ;;  %v933_v24 = vadd.f32 %v932_v61, %v781_v22 }
 0x244   :  { %v1592_v23 = vpack.c.bf16 %v994_v19, %v992_v6  ;;  %v935_v27 = vadd.f32 %v934_v21, %v781_v22  ;;  %v1011_v22 = vld [vmem:[%s2396_s5] sm:$0xff] }
 0x245   :  { %v995_v30 = vmax.f32 %v933_v24, 0.0  ;;  %v1013_v24 = vld [vmem:[%s2396_s5 + $0x10] sm:$0xff] }
 0x246   :  { %v938_v28 = vpop.f32.mrb[50].mxu0  ;;  %1593 = vmatprep.subr.bf16.mxu1 %v1592_v23  ;;  %v996_v33 = vmax.f32 %v935_v27, 0.0  ;;  %v1012_v23 = vld [vmem:[%s2396_s5 + $0x8] sm:$0xff]  ;;  %v1015_v27 = vld [vmem:[%s2396_s5 + $0x20] sm:$0xff] }
 0x247   :  { %v939_v11 = vadd.f32 %v938_v28, %v786_v26  ;;  %v940_v2 = vpop.f32.mrb[51].mxu0  ;;  %1595 = vmatpush1.bf16.msra.mxu1 %v1594_v20  ;;  %v1016_v28 = vld [vmem:[%s2396_s5 + $0x28] sm:$0xff] }
 0x248   :  { %v941_v63 = vadd.f32 %v940_v2, %v786_v26  ;;  %v1014_v26 = vld [vmem:[%s2396_s5 + $0x18] sm:$0xff] }
 0x249   :  { %v997_v31 = vmax.f32 %v939_v11, 0.0  ;;  %v1017_v11 = vld [vmem:[%s2396_s5 + $0x30] sm:$0xff]  ;;  %v1018_v2 = vld [vmem:[%s2396_s5 + $0x38] sm:$0xff] }
 0x24a   :  { %v998_v34 = vmax.f32 %v941_v63, 0.0  ;;  %v944_v35 = vpop.f32.mrb[52].mxu0  ;;  %v1019_v63 = vld [vmem:[%s2396_s5 + $0x40] sm:$0xff] }
 0x24b   :  { %v1598_v36 = vpack.c.bf16 %v997_v31, %v995_v30  ;;  %v946_v7 = vpop.f32.mrb[53].mxu0  ;;  %v945_v39 = vadd.f32 %v944_v35, %v791_v38  ;;  %v1020_v30 = vld [vmem:[%s2396_s5 + $0x48] sm:$0xff]  ;;  %v1021_v31 = vld [vmem:[%s2396_s5 + $0x50] sm:$0xff] }
 0x24c   :  { %v1596_v3 = vpack.c.bf16 %v998_v34, %v996_v33  ;;  %v947_v42 = vadd.f32 %v946_v7, %v791_v38  ;;  %v1022_v33 = vld [vmem:[%s2396_s5 + $0x58] sm:$0xff]  ;;  %v1023_v34 = vld [vmem:[%s2396_s5 + $0x60] sm:$0xff]  ;;  %v1024_v35 = vld [vmem:[%s2396_s5 + $0x68] sm:$0xff] }
 0x24d   :  { %v999_v9 = vmax.f32 %v945_v39, 0.0  ;;  %v1026_v7 = vld [vmem:[%s2396_s5 + $0x78] sm:$0xff]  ;;  %v1046_v39 = vpop.permute.xlu0 %1045 }
 0x24e   :  { %v950_v43 = vpop.f32.mrb[54].mxu0  ;;  %1597 = vmatprep.subr.bf16.mxu1 %v1596_v3  ;;  %v1000_v0 = vmax.f32 %v947_v42, 0.0  ;;  %v1051_v42 = vpop.permute.xlu1 %1050 }
 0x24f   :  { %v951_v44 = vadd.f32 %v950_v43, %v796_v40  ;;  %v952_v46 = vpop.f32.mrb[55].mxu0  ;;  %1599 = vmatpush1.bf16.msra.mxu1 %v1598_v36  ;;  %v1025_v36 = vld [vmem:[%s2396_s5 + $0x70] sm:$0xff] }
 0x250   :  { %v953_v12 = vadd.f32 %v952_v46, %v796_v40 }
 0x251   :  { %v1001_v48 = vmax.f32 %v951_v44, 0.0 }
 0x252   :  { %v1002_v50 = vmax.f32 %v953_v12, 0.0  ;;  %v956_v51 = vpop.f32.mrb[56].mxu0 }
 0x253   :  { %v1602_v13 = vpack.c.bf16 %v1001_v48, %v999_v9  ;;  %v958_v45 = vpop.f32.mrb[57].mxu0  ;;  %v957_v29 = vadd.f32 %v956_v51, %v801_v49 }
 0x254   :  { %v1600_v25 = vpack.c.bf16 %v1002_v50, %v1000_v0  ;;  %v959_v59 = vadd.f32 %v958_v45, %v801_v49  ;;  %v1056_v49 = vpop.permute.xlu0 %1055 }
 0x255   :  { %v1003_v41 = vmax.f32 %v957_v29, 0.0 }
 0x256   :  { %v962_v32 = vpop.f32.mrb[58].mxu0  ;;  %1601 = vmatprep.subr.bf16.mxu1 %v1600_v25  ;;  %v1004_v52 = vmax.f32 %v959_v59, 0.0 }
 0x257   :  { %v963_v37 = vadd.f32 %v962_v32, %v806_v54  ;;  %v964_v4 = vpop.f32.mrb[59].mxu0  ;;  %1603 = vmatpush1.bf16.msra.mxu1 %v1602_v13 }
 0x258   :  { %v965_v18 = vadd.f32 %v964_v4, %v806_v54  ;;  %v1061_v54 = vpop.permute.xlu1 %1060 }
 0x259   :  { %v1005_v47 = vmax.f32 %v963_v37, 0.0 }
 0x25a   :  { %v1006_v53 = vmax.f32 %v965_v18, 0.0  ;;  %v968_v55 = vpop.f32.mrb[60].mxu0 }
 0x25b   :  { %v1606_v56 = vpack.c.bf16 %v1005_v47, %v1003_v41  ;;  %v970_v57 = vpop.f32.mrb[61].mxu0  ;;  %v969_v1 = vadd.f32 %v968_v55, %v811_v5 }
 0x25c   :  { %v1604_v58 = vpack.c.bf16 %v1006_v53, %v1004_v52  ;;  %v971_v62 = vadd.f32 %v970_v57, %v811_v5  ;;  %v1066_v5 = vpop.permute.xlu0 %1065 }
 0x25d   :  { %v1007_v10 = vmax.f32 %v969_v1, 0.0 }
 0x25e   :  { %v974_v14 = vpop.f32.mrb[62].mxu0  ;;  %1605 = vmatprep.subr.bf16.mxu1 %v1604_v58  ;;  %v1008_v19 = vmax.f32 %v971_v62, 0.0 }
 0x25f   :  { %v975_v15 = vadd.f32 %v974_v14, %v816_v60  ;;  %v976_v16 = vpop.f32.mrb[63].mxu0  ;;  %1607 = vmatpush1.bf16.msra.mxu1 %v1606_v56 }
 0x260   :  { %v977_v17 = vadd.f32 %v976_v16, %v816_v60  ;;  %v1071_v60 = vpop.permute.xlu1 %1070 }
 0x261   :  { %v1009_v6 = vmax.f32 %v975_v15, 0.0 }
 0x262   :  { %v1010_v61 = vmax.f32 %v977_v17, 0.0 }
 0x263   :  { %v1610_v20 = vpack.c.bf16 %v1009_v6, %v1007_v10 }
 0x264   :  { %v1608_v21 = vpack.c.bf16 %v1010_v61, %v1008_v19 }
 0x266   :  { %1609 = vmatprep.subr.bf16.mxu1 %v1608_v21 }
 0x267   :  { %1611 = vmatpush1.bf16.msra.mxu1 %v1610_v20 }
 0x26a   :  { %1188 = vmatmul.mubr.f32.vlgmr.msra.gmra.mrb[32].mxu1 %v1011_v22 }
 0x26b   :  { %1193 = vmatprep.mubr.f32.mxu1 %v1669_v8 }
 0x26e   :  { %1194 = vmatmul.mubr.f32.gmra.mrb[34].mxu1 %v1012_v23  ;;  %v1076_v23 = vpop.permute.xlu0 %1075 }
 0x26f   :  { %1199 = vmatprep.mubr.f32.mxu1 %v1669_v8 }
 0x272   :  { %1200 = vmatmul.mubr.f32.gmra.mrb[36].mxu1 %v1013_v24 }
 0x273   :  { %1205 = vmatprep.mubr.f32.mxu1 %v1669_v8 }
 0x276   :  { %1206 = vmatmul.mubr.f32.gmra.mrb[38].mxu1 %v1014_v26 }
 0x277   :  { %1211 = vmatprep.mubr.f32.mxu1 %v1669_v8 }
 0x27a   :  { %1212 = vmatmul.mubr.f32.gmra.mrb[40].mxu1 %v1015_v27  ;;  %v1081_v27 = vpop.permute.xlu1 %1080 }
 0x27b   :  { %1217 = vmatprep.mubr.f32.mxu1 %v1669_v8 }
 0x27e   :  { %1218 = vmatmul.mubr.f32.gmra.mrb[42].mxu1 %v1016_v28 }
 0x27f   :  { %1223 = vmatprep.mubr.f32.mxu1 %v1669_v8 }
 0x282   :  { %1224 = vmatmul.mubr.f32.gmra.mrb[44].mxu1 %v1017_v11 }
 0x283   :  { %1229 = vmatprep.mubr.f32.mxu1 %v1669_v8 }
 0x286   :  { %1230 = vmatmul.mubr.f32.gmra.mrb[46].mxu1 %v1018_v2 }
 0x287   :  { %1235 = vmatprep.mubr.f32.mxu1 %v1669_v8 }
 0x28a   :  { %1236 = vmatmul.mubr.f32.gmra.mrb[48].mxu1 %v1019_v63 }
 0x28b   :  { %1241 = vmatprep.mubr.f32.mxu1 %v1669_v8 }
 0x28e   :  { %1242 = vmatmul.mubr.f32.gmra.mrb[50].mxu1 %v1020_v30 }
 0x28f   :  { %1247 = vmatprep.mubr.f32.mxu1 %v1669_v8 }
 0x292   :  { %1248 = vmatmul.mubr.f32.gmra.mrb[52].mxu1 %v1021_v31 }
 0x293   :  { %1253 = vmatprep.mubr.f32.mxu1 %v1669_v8 }
 0x296   :  { %1254 = vmatmul.mubr.f32.gmra.mrb[54].mxu1 %v1022_v33 }
 0x297   :  { %1259 = vmatprep.mubr.f32.mxu1 %v1669_v8 }
 0x29a   :  { %1260 = vmatmul.mubr.f32.gmra.mrb[56].mxu1 %v1023_v34 }
 0x29b   :  { %1265 = vmatprep.mubr.f32.mxu1 %v1669_v8 }
 0x29e   :  { %1266 = vmatmul.mubr.f32.gmra.mrb[58].mxu1 %v1024_v35 }
 0x29f   :  { %1271 = vmatprep.mubr.f32.mxu1 %v1669_v8 }
 0x2a2   :  { %1272 = vmatmul.mubr.f32.gmra.mrb[60].mxu1 %v1025_v36 }
 0x2a3   :  { %1277 = vmatprep.mubr.f32.mxu1 %v1669_v8 }
 0x2a6   :  { %1278 = vmatmul.mubr.f32.gmra.mrb[62].mxu1 %v1026_v7 }
 0x33d   :  { %v1189_v38 = vpop.f32.mrb[32].mxu1 }
 0x33e   :  { %v1191_v3 = vpop.f32.mrb[33].mxu1  ;;  %v1190_v40 = vadd.f32 %v1189_v38, %v1046_v39 }
 0x33f   :  { %v1192_v43 = vadd.f32 %v1191_v3, %v1046_v39  ;;  %v1086_v3 = vpop.permute.xlu0 %1085 }
 0x340   :  { %v1284_v48 = vmax.f32 %v1190_v40, 0.0 }
 0x341   :  { %v1195_v44 = vpop.f32.mrb[34].mxu1  ;;  %v1285_v50 = vmax.f32 %v1192_v43, 0.0 }
 0x342   :  { %v1196_v46 = vadd.f32 %v1195_v44, %v1051_v42  ;;  %v1197_v12 = vpop.f32.mrb[35].mxu1 }
 0x343   :  { %v1198_v9 = vadd.f32 %v1197_v12, %v1051_v42  ;;  %v1091_v42 = vpop.permute.xlu1 %1090 }
 0x344   :  { %v1286_v0 = vmax.f32 %v1196_v46, 0.0 }
 0x345   :  { %v1287_v51 = vmax.f32 %v1198_v9, 0.0  ;;  %v1201_v8 = vpop.f32.mrb[36].mxu1 }
 0x346   :  { %v1614_v13 = vpack.c.bf16 %v1286_v0, %v1284_v48  ;;  %v1203_v45 = vpop.f32.mrb[37].mxu1  ;;  %v1202_v29 = vadd.f32 %v1201_v8, %v1056_v49 }
 0x347   :  { %v1612_v25 = vpack.c.bf16 %v1287_v51, %v1285_v50  ;;  %v1204_v59 = vadd.f32 %v1203_v45, %v1056_v49  ;;  %v1096_v49 = vpop.permute.xlu0 %1095 }
 0x348   :  { %v1288_v41 = vmax.f32 %v1202_v29, 0.0 }
 0x349   :  { %v1207_v32 = vpop.f32.mrb[38].mxu1  ;;  %1613 = vmatprep.subr.bf16.mxu0 %v1612_v25  ;;  %v1289_v52 = vmax.f32 %v1204_v59, 0.0 }
 0x34a   :  { %v1208_v37 = vadd.f32 %v1207_v32, %v1061_v54  ;;  %v1209_v4 = vpop.f32.mrb[39].mxu1  ;;  %1615 = vmatpush1.bf16.msra.mxu0 %v1614_v13 }
 0x34b   :  { %v1210_v18 = vadd.f32 %v1209_v4, %v1061_v54  ;;  %v1101_v54 = vpop.permute.xlu1 %1100 }
 0x34c   :  { %v1290_v47 = vmax.f32 %v1208_v37, 0.0 }
 0x34d   :  { %v1291_v53 = vmax.f32 %v1210_v18, 0.0  ;;  %v1213_v55 = vpop.f32.mrb[40].mxu1 }
 0x34e   :  { %v1618_v56 = vpack.c.bf16 %v1290_v47, %v1288_v41  ;;  %v1215_v57 = vpop.f32.mrb[41].mxu1  ;;  %v1214_v1 = vadd.f32 %v1213_v55, %v1066_v5 }
 0x34f   :  { %v1616_v58 = vpack.c.bf16 %v1291_v53, %v1289_v52  ;;  %v1216_v62 = vadd.f32 %v1215_v57, %v1066_v5  ;;  %v1106_v5 = vpop.permute.xlu0 %1105 }
 0x350   :  { %v1292_v10 = vmax.f32 %v1214_v1, 0.0 }
 0x351   :  { %v1219_v14 = vpop.f32.mrb[42].mxu1  ;;  %1617 = vmatprep.subr.bf16.mxu0 %v1616_v58  ;;  %v1293_v19 = vmax.f32 %v1216_v62, 0.0 }
 0x352   :  { %v1220_v15 = vadd.f32 %v1219_v14, %v1071_v60  ;;  %v1221_v16 = vpop.f32.mrb[43].mxu1  ;;  %1619 = vmatpush1.bf16.msra.mxu0 %v1618_v56 }
 0x353   :  { %v1222_v17 = vadd.f32 %v1221_v16, %v1071_v60  ;;  %v1111_v60 = vpop.permute.xlu1 %1110 }
 0x354   :  { %v1294_v6 = vmax.f32 %v1220_v15, 0.0 }
 0x355   :  { %v1295_v61 = vmax.f32 %v1222_v17, 0.0  ;;  %v1225_v20 = vpop.f32.mrb[44].mxu1 }
 0x356   :  { %v1622_v21 = vpack.c.bf16 %v1294_v6, %v1292_v10  ;;  %v1227_v22 = vpop.f32.mrb[45].mxu1  ;;  %v1226_v26 = vadd.f32 %v1225_v20, %v1076_v23 }
 0x357   :  { %v1620_v24 = vpack.c.bf16 %v1295_v61, %v1293_v19  ;;  %v1228_v28 = vadd.f32 %v1227_v22, %v1076_v23  ;;  %v1116_v23 = vpop.permute.xlu0 %1115 }
 0x358   :  { %v1296_v31 = vmax.f32 %v1226_v26, 0.0 }
 0x359   :  { %v1231_v11 = vpop.f32.mrb[46].mxu1  ;;  %1621 = vmatprep.subr.bf16.mxu0 %v1620_v24  ;;  %v1297_v34 = vmax.f32 %v1228_v28, 0.0 }
 0x35a   :  { %v1232_v2 = vadd.f32 %v1231_v11, %v1081_v27  ;;  %v1233_v63 = vpop.f32.mrb[47].mxu1  ;;  %1623 = vmatpush1.bf16.msra.mxu0 %v1622_v21 }
 0x35b   :  { %v1234_v30 = vadd.f32 %v1233_v63, %v1081_v27  ;;  %v1121_v27 = vpop.permute.xlu1 %1120 }
 0x35c   :  { %v1298_v33 = vmax.f32 %v1232_v2, 0.0 }
 0x35d   :  { %v1299_v35 = vmax.f32 %v1234_v30, 0.0  ;;  %v1237_v36 = vpop.f32.mrb[48].mxu1 }
 0x35e   :  { %v1626_v7 = vpack.c.bf16 %v1298_v33, %v1296_v31  ;;  %v1239_v38 = vpop.f32.mrb[49].mxu1  ;;  %v1238_v40 = vadd.f32 %v1237_v36, %v1086_v3 }
 0x35f   :  { %v1624_v39 = vpack.c.bf16 %v1299_v35, %v1297_v34  ;;  %v1240_v43 = vadd.f32 %v1239_v38, %v1086_v3  ;;  %v1316_v38 = vld [vmem:[%s2397_s7] sm:$0xff]  ;;  %v1321_v3 = vpop.permute.xlu0 %1320 }
 0x360   :  { %v1300_v48 = vmax.f32 %v1238_v40, 0.0 }
 0x361   :  { %v1243_v44 = vpop.f32.mrb[50].mxu1  ;;  %1625 = vmatprep.subr.bf16.mxu0 %v1624_v39  ;;  %v1301_v50 = vmax.f32 %v1240_v43, 0.0 }
 0x362   :  { %v1244_v46 = vadd.f32 %v1243_v44, %v1091_v42  ;;  %v1245_v12 = vpop.f32.mrb[51].mxu1  ;;  %1627 = vmatpush1.bf16.msra.mxu0 %v1626_v7  ;;  %v1400_v44 = vlaneseq }
 0x363   :  { %v1246_v9 = vadd.f32 %v1245_v12, %v1091_v42 }
 0x364   :  { %v1302_v0 = vmax.f32 %v1244_v46, 0.0  ;;  %v2375_v46 = vshrl.u32 %v1400_v44, 7 }
 0x365   :  { %v1303_v51 = vmax.f32 %v1246_v9, 0.0  ;;  %v1249_v8 = vpop.f32.mrb[52].mxu1 }
 0x366   :  { %v1630_v13 = vpack.c.bf16 %v1302_v0, %v1300_v48  ;;  %v1251_v45 = vpop.f32.mrb[53].mxu1  ;;  %v1250_v29 = vadd.f32 %v1249_v8, %v1096_v49  ;;  %vm1402_vm2 = vcmp.ge.s32.totalorder %v2375_v46, 1  ;;  %vm1420_vm8 = vcmp.eq.s32.totalorder %v2375_v46, 0 }
 0x367   :  { %v1628_v25 = vpack.c.bf16 %v1303_v51, %v1301_v50  ;;  %v1252_v59 = vadd.f32 %v1251_v45, %v1096_v49 }
 0x368   :  { %v1304_v41 = vmax.f32 %v1250_v29, 0.0 }
 0x369   :  { %v1255_v32 = vpop.f32.mrb[54].mxu1  ;;  %1629 = vmatprep.subr.bf16.mxu0 %v1628_v25  ;;  %v1305_v52 = vmax.f32 %v1252_v59, 0.0 }
 0x36a   :  { %v1256_v37 = vadd.f32 %v1255_v32, %v1101_v54  ;;  %v1257_v4 = vpop.f32.mrb[55].mxu1  ;;  %1631 = vmatpush1.bf16.msra.mxu0 %v1630_v13 }
 0x36b   :  { %v1258_v18 = vadd.f32 %v1257_v4, %v1101_v54 }
 0x36c   :  { %v1306_v47 = vmax.f32 %v1256_v37, 0.0 }
 0x36d   :  { %v1307_v53 = vmax.f32 %v1258_v18, 0.0  ;;  %v1261_v55 = vpop.f32.mrb[56].mxu1 }
 0x36e   :  { %v1634_v56 = vpack.c.bf16 %v1306_v47, %v1304_v41  ;;  %v1263_v57 = vpop.f32.mrb[57].mxu1  ;;  %v1262_v1 = vadd.f32 %v1261_v55, %v1106_v5 }
 0x36f   :  { %v1632_v58 = vpack.c.bf16 %v1307_v53, %v1305_v52  ;;  %v1264_v62 = vadd.f32 %v1263_v57, %v1106_v5 }
 0x370   :  { %v1308_v10 = vmax.f32 %v1262_v1, 0.0 }
 0x371   :  { %v1267_v14 = vpop.f32.mrb[58].mxu1  ;;  %1633 = vmatprep.subr.bf16.mxu0 %v1632_v58  ;;  %v1309_v19 = vmax.f32 %v1264_v62, 0.0 }
 0x372   :  { %v1268_v15 = vadd.f32 %v1267_v14, %v1111_v60  ;;  %v1269_v16 = vpop.f32.mrb[59].mxu1  ;;  %1635 = vmatpush1.bf16.msra.mxu0 %v1634_v56 }
 0x373   :  { %v1270_v17 = vadd.f32 %v1269_v16, %v1111_v60 }
 0x374   :  { %v1310_v6 = vmax.f32 %v1268_v15, 0.0 }
 0x375   :  { %v1311_v61 = vmax.f32 %v1270_v17, 0.0  ;;  %v1273_v20 = vpop.f32.mrb[60].mxu1 }
 0x376   :  { %v1638_v21 = vpack.c.bf16 %v1310_v6, %v1308_v10  ;;  %v1275_v22 = vpop.f32.mrb[61].mxu1  ;;  %v1274_v26 = vadd.f32 %v1273_v20, %v1116_v23 }
 0x377   :  { %v1636_v24 = vpack.c.bf16 %v1311_v61, %v1309_v19  ;;  %v1276_v28 = vadd.f32 %v1275_v22, %v1116_v23 }
 0x378   :  { %v1312_v31 = vmax.f32 %v1274_v26, 0.0 }
 0x379   :  { %v1279_v11 = vpop.f32.mrb[62].mxu1  ;;  %1637 = vmatprep.subr.bf16.mxu0 %v1636_v24  ;;  %v1313_v34 = vmax.f32 %v1276_v28, 0.0 }
 0x37a   :  { %v1280_v2 = vadd.f32 %v1279_v11, %v1121_v27  ;;  %v1281_v63 = vpop.f32.mrb[63].mxu1  ;;  %1639 = vmatpush1.bf16.msra.mxu0 %v1638_v21 }
 0x37b   :  { %v1282_v30 = vadd.f32 %v1281_v63, %v1121_v27 }
 0x37c   :  { %v1314_v33 = vmax.f32 %v1280_v2, 0.0 }
 0x37d   :  { %v1315_v35 = vmax.f32 %v1282_v30, 0.0 }
 0x37e   :  { %v1642_v36 = vpack.c.bf16 %v1314_v33, %v1312_v31 }
 0x37f   :  { %v1640_v7 = vpack.c.bf16 %v1315_v35, %v1313_v34 }
 0x381   :  { %1641 = vmatprep.subr.bf16.mxu0 %v1640_v7 }
 0x382   :  { %1643 = vmatpush1.bf16.msra.mxu0 %v1642_v36 }
 0x385   :  { %1388 = vmatmul.mubr.f32.vlgmr.msra.gmra.mrb[64].mxu0 %v1316_v38 }
 0x458   :  { %v1389_v39 = vpop.f32.mrb[64].mxu0 }
 0x459   :  { %v1390_v40 = vadd.f32 %v1389_v39, %v1321_v3  ;;  %v1391_v42 = vpop.f32.mrb[65].mxu0 }
 0x45a   :  { %v1392_v43 = vadd.f32 %v1391_v42, %v1321_v3 }
 0x45b   :  { %1394 = vmax.xlane.f32.xlu1 %v1390_v40 }
 0x45c   :  { %1396 = vmax.xlane.f32.xlu0 %v1392_v43 }
 0x4e8   :  { %v1395_v12 = vpop.xlane.xlu1 %1394 }
 0x4e9   :  { %v1397_v9 = vpop.xlane.xlu0 %1396 }
 0x4ea   :  { %v1399_v48 = vsel %vm1398_vm1, %v1395_v12, %v1397_v9 }
 0x4eb   :  { %v1403_v0 = vmul.f32 %v1399_v48, %v1399_v48  ;;  %v1498_v47 = vmul.f32 -1.442695, %v1399_v48 }
 0x4ed   :  { %v1404_v50 = vsel %vm1402_vm2, %v1403_v0, 0.0  ;;  %v1433_v51 = vrot.slane %v1403_v0, 4 }
 0x4ee   :  { %v1406_v8 = vsel %vm1405_vm3, %v1404_v50, 0.0 }
 0x4ef   :  { %v1407_v13 = vrot.slane %v1406_v8, 4  ;;  %v1435_v45 = vsel %vm1402_vm2, %v1433_v51, 0.0 }
 0x4f0   :  { %v1436_v49 = vsel %vm1405_vm3, %v1435_v45, 0.0 }
 0x4f1   :  { %v1408_v25 = vadd.f32 %v1407_v13, %v1406_v8  ;;  %v1437_v29 = vrot.slane %v1436_v49, 4 }
 0x4f3   :  { %v1409_v54 = vrot.slane %v1408_v25, 2  ;;  %v1438_v59 = vadd.f32 %v1437_v29, %v1436_v49 }
 0x4f5   :  { %v1410_v32 = vadd.f32 %v1409_v54, %v1408_v25  ;;  %v1439_v37 = vrot.slane %v1438_v59, 2 }
 0x4f7   :  { %v1411_v4 = vrot.slane %v1410_v32, 1  ;;  %v1440_v18 = vadd.f32 %v1439_v37, %v1438_v59 }
 0x4f9   :  { %v1412_v41 = vadd.f32 %v1411_v4, %v1410_v32  ;;  %v1441_v52 = vrot.slane %v1440_v18, 1 }
 0x4fb   :  { %1656 = vrsqrt.f32 %v1412_v41  ;;  %v1442_v53 = vadd.f32 %v1441_v52, %v1440_v18  ;;  %vm1415_vm4 = vcmp.eq.f32.partialorder %v1412_v41, inf  ;;  %v1418_v5 = vand.u32 2147483648, %v1412_v41 }
 0x4fc   :  { %1658 = vpow2.f32 %v1498_v47  ;;  %vm1417_vm5 = vcmp.eq.f32.partialorder %v1412_v41, 0.0 }
 0x4fd   :  { %1660 = vrsqrt.f32 %v1442_v53  ;;  %vm1445_vm6 = vcmp.eq.f32.partialorder %v1442_v53, inf  ;;  %v1448_v16 = vand.u32 2147483648, %v1442_v53  ;;  %vm1447_vm7 = vcmp.eq.f32.partialorder %v1442_v53, 0.0 }
 0x505   :  { %v1657_v55 = vpop.eup %1656 }
 0x506   :  { %v1414_v56 = vmul.f32 %v1657_v55, %v1412_v41  ;;  %v1659_v57 = vpop.eup %1658 }
 0x507   :  { %v1661_v58 = vpop.eup %1660  ;;  %v1424_v14 = vadd.f32 1.0, %v1659_v57 }
 0x508   :  { %v1416_v1 = vsel %vm1415_vm4, %v1412_v41, %v1414_v56  ;;  %v1444_v62 = vmul.f32 %v1661_v58, %v1442_v53 }
 0x509   :  { %v1419_v60 = vsel %vm1417_vm5, %v1418_v5, %v1416_v1 }
 0x50a   :  { %v1427_v15 = vadd.f32 1e-06, %v1419_v60  ;;  %v1446_v17 = vsel %vm1445_vm6, %v1442_v53, %v1444_v62 }
 0x50b   :  { %v1449_v10 = vsel %vm1447_vm7, %v1448_v16, %v1446_v17 }
 0x50c   :  { %1662 = vrcp.f32 %v1427_v15  ;;  %v1450_v6 = vadd.f32 1e-06, %v1449_v10 }
 0x50d   :  { %1664 = vrcp.f32 %v1424_v14 }
 0x50e   :  { %1666 = vrcp.f32 %v1450_v6 }
 0x516   :  { %v1663_v19 = vpop.eup %1662 }
 0x517   :  { %v1429_v61 = vmul.f32 %v1663_v19, %v1399_v48  ;;  %v1665_v20 = vpop.eup %1664 }
 0x518   :  { %v1667_v21 = vpop.eup %1666  ;;  %v1454_v24 = vrot.slane %v1665_v20, 4 }
 0x519   :  { %v1430_v22 = vsel %vm1420_vm8, %v1665_v20, %v1429_v61  ;;  %v1452_v23 = vmul.f32 %v1667_v21, %v1399_v48 }
 0x51a   :  { %1431 = vst.msk [vmem:[%s2398_s9] sm:$0xf] %vm1405_vm3, %v1430_v22 }
 0x51b   :  { %v1457_v26 = vrot.slane %v1452_v23, 4 }
 0x51d   :  { %v1459_v27 = vsel %vm1420_vm8, %v1454_v24, %v1457_v26 }
 0x51e   :  { %1499 = vst.msk [vmem:[%s2398_s9 + $0x4] sm:$0xf] %vm1405_vm3, %v1459_v27 }

</bundles_post_ra>
